<compile_context>
chip_gen: v6e
topology: v6e:2x2x1
jax: 0.10.0
libtpu: 0.0.40
codegen_flags: <defaults>
</compile_context>

<pallas_src>
import functools

import jax
import jax.numpy as jnp
from jax import lax
from jax.experimental import pallas as pl
from jax.experimental.pallas import tpu as pltpu


def _round_up(x, m):
    return (x + m - 1) // m * m


# ----------------------------------------------------------------------------
# Pallas kernel
# ----------------------------------------------------------------------------
def _make_kernel(D, H, W, Hp, Wp, Ch, Co, compute_dtype):
    HWp = Hp * Wp
    inv_count = 1.0 / float(D * H * W)

    def kernel(x_ref, w1_ref, gamma_ref, beta_ref, w2_ref, b2_ref, mask_ref,
               out_ref, sum_ref, sqsum_ref, scale_ref, shift_ref, h_ref):
        p = pl.program_id(1)          # 0: statistics pass, 1: output pass
        t = pl.program_id(2)          # depth plane index

        @pl.when((p == 0) & (t == 0))
        def _init():
            sum_ref[...] = jnp.zeros_like(sum_ref)
            sqsum_ref[...] = jnp.zeros_like(sqsum_ref)

        # ---- pass 0: 3x3x3 conv for plane `t` (27 shifted-slab matmuls) ----
        # Slabs are static lane-offset slices of the padded, VMEM-resident
        # input planes (no HBM im2col).  Results are cached in VMEM so pass 1
        # never recomputes them.
        @pl.when(p == 0)
        def _conv_and_stats():
            h = jnp.zeros((Ch, HWp), jnp.float32)
            for kd in range(3):
                plane = x_ref[t + kd]                        # (Cin, PLEN)
                for kh in range(3):
                    for kw in range(3):
                        off = kh * Wp + kw
                        xs = plane[:, off:off + HWp]         # (Cin, HWp)
                        w_tap = w1_ref[kd * 9 + kh * 3 + kw]  # (Ch, Cin)
                        h = h + jnp.dot(w_tap, xs,
                                        preferred_element_type=jnp.float32)
            h_ref[t] = h                                     # VMEM activation cache
            hm = h * mask_ref[...]                           # zero H/W halo lanes
            sum_ref[...] += jnp.sum(hm, axis=1, keepdims=True)
            sqsum_ref[...] += jnp.sum(h * hm, axis=1, keepdims=True)

        # ---- end of pass 0: fold InstanceNorm affine into (scale, shift) ---
        @pl.when((p == 0) & (t == D - 1))
        def _finalize_stats():
            mean = sum_ref[...] * inv_count                  # (Ch, 1)
            var = jnp.maximum(sqsum_ref[...] * inv_count - mean * mean, 0.0)
            inv_std = lax.rsqrt(var + 1e-5)
            scale = inv_std * gamma_ref[...]
            scale_ref[...] = scale
            shift_ref[...] = beta_ref[...] - mean * scale

        # ---- pass 1: normalize + LeakyReLU + 1x1x1 conv + lane-dense store -
        @pl.when(p == 1)
        def _emit():
            hn = h_ref[t] * scale_ref[...] + shift_ref[...]
            hn = jnp.maximum(hn, 0.2 * hn)                   # LeakyReLU(0.2)
            o = jnp.dot(w2_ref[...], hn.astype(compute_dtype),
                        preferred_element_type=jnp.float32)
            out_ref[...] = o + b2_ref[...]

    return kernel


def _fused_conv_norm_act_conv(xp, w1t, gamma, beta, w2, b2, mask,
                              *, D, H, W, Hp, Wp, compute_dtype):
    N, Dp, Cin, PLEN = xp.shape
    Ch = w1t.shape[1]
    Co = w2.shape[0]
    HWp = Hp * Wp

    kernel = _make_kernel(D, H, W, Hp, Wp, Ch, Co, compute_dtype)

    itemsize = jnp.dtype(compute_dtype).itemsize
    # conv1 is computed exactly once per (n, d) now (activations cached).
    flops = N * D * (27 * 2 * Ch * Cin * HWp + 2 * Co * Ch * HWp)
    bytes_accessed = (xp.size * itemsize + N * D * Co * HWp * 4
                      + (w1t.size + w2.size) * itemsize
                      + (gamma.size + beta.size + b2.size + mask.size) * 4)

    return pl.pallas_call(
        kernel,
        out_shape=jax.ShapeDtypeStruct((N, D, Co, HWp), jnp.float32),
        grid_spec=pltpu.PrefetchScalarGridSpec(
            num_scalar_prefetch=0,
            grid=(N, 2, D),
            in_specs=[
                # Whole zero-padded volume of one batch element stays resident
                # in VMEM across both passes (DMA'd from HBM once per n).
                # TODO(synk): for very large D*H*W also tile this block (and
                # the activation cache) along D so it fits v7x's 64 MiB VMEM.
                pl.BlockSpec((None, Dp, Cin, PLEN),
                             lambda n, p, t: (n, 0, 0, 0)),
                pl.BlockSpec((27, Ch, Cin), lambda n, p, t: (0, 0, 0)),
                pl.BlockSpec((Ch, 1), lambda n, p, t: (0, 0)),
                pl.BlockSpec((Ch, 1), lambda n, p, t: (0, 0)),
                pl.BlockSpec((Co, Ch), lambda n, p, t: (0, 0)),
                pl.BlockSpec((Co, 1), lambda n, p, t: (0, 0)),
                pl.BlockSpec((1, HWp), lambda n, p, t: (0, 0)),
            ],
            # During the statistics pass (p == 0) the block index is pinned to
            # plane 0 and never written (no spurious HBM write-backs); the
            # output pass (p == 1) writes one depth plane per grid step.
            out_specs=pl.BlockSpec((None, None, Co, HWp),
                                   lambda n, p, t: (n, p * t, 0, 0)),
            scratch_shapes=[pltpu.VMEM((Ch, 1), jnp.float32),   # sum
                            pltpu.VMEM((Ch, 1), jnp.float32),   # sum of squares
                            pltpu.VMEM((Ch, 1), jnp.float32),   # fused scale
                            pltpu.VMEM((Ch, 1), jnp.float32),   # fused shift
                            pltpu.VMEM((D, Ch, HWp), jnp.float32)],  # h cache
        ),
        compiler_params=pltpu.CompilerParams(
            dimension_semantics=("parallel", "arbitrary", "arbitrary"),
            vmem_limit_bytes=32 * 1024 * 1024,
        ),
        cost_estimate=pl.CostEstimate(flops=int(flops),
                                      transcendentals=int(N * Ch),
                                      bytes_accessed=int(bytes_accessed)),
    )(xp, w1t, gamma, beta, w2, b2, mask)


# ----------------------------------------------------------------------------
# Plain-JAX glue (layout only; all math is inside the Pallas kernel)
# ----------------------------------------------------------------------------
def _pixel_shuffle_nd_3d(x, r):
    """Exact replication of PixelShuffleNd.pixel_shuffle for 5-D input."""
    N, C, D, H, W = x.shape
    Cout = C // (r ** 3)
    v = x.reshape(N, Cout, r, r, r, D, H, W)
    v = jnp.transpose(v, (0, 1, 6, 4, 2, 7, 5, 3))
    return v.reshape(N, Cout, D * r, H * r, W * r)


def conv_pixel_shuffle_lite3d(x, w_conv1, gamma, beta, w_conv2, b_conv2, r,
                              compute_dtype=jnp.bfloat16):
    """Forward pass.  x: (N, C_in, D, H, W) float32 (NCDHW, as in PyTorch)."""
    N, Cin, D, H, W = x.shape
    Ch = w_conv1.shape[0]
    Co = w_conv2.shape[0]            # out_channels * r**3
    Dp, Hp, Wp = D + 2, H + 2, W + 2
    HWp = Hp * Wp
    # Per-plane lane length: room for the largest static tap offset
    # (2*Wp + 2), rounded up to a multiple of 128 for aligned dense DMAs.
    PLEN = _round_up(HWp + 2 * Wp + 2, 128)

    # Zero-pad spatially ('same' for k=3), lay out as (N, Dp, Cin, Hp*Wp) and
    # pad each flattened plane to PLEN lanes.  This single cheap XLA pass is
    # the only input pre-processing (no 27x im2col materialization).
    xp = jnp.pad(x, ((0, 0), (0, 0), (1, 1), (1, 1), (1, 1)))
    xp = jnp.transpose(xp, (0, 2, 1, 3, 4)).reshape(N, Dp, Cin, HWp)
    xp = jnp.pad(xp, ((0, 0), (0, 0), (0, 0), (0, PLEN - HWp)))
    xp = xp.astype(compute_dtype)

    # (Ch, Cin, 3, 3, 3) -> 27 taps of (Ch, Cin), tap index = kd*9 + kh*3 + kw.
    w1t = jnp.transpose(w_conv1, (2, 3, 4, 0, 1)).reshape(27, Ch, Cin)
    w1t = w1t.astype(compute_dtype)
    w2 = w_conv2.reshape(Co, Ch).astype(compute_dtype)
    gam = gamma.reshape(Ch, 1).astype(jnp.float32)
    bet = beta.reshape(Ch, 1).astype(jnp.float32)
    b2 = b_conv2.reshape(Co, 1).astype(jnp.float32)

    # Valid-lane mask (1 where hp < H and wp < W) for the norm statistics.
    lane = jnp.arange(HWp, dtype=jnp.int32)
    mask = (((lane // Wp) < H) & ((lane % Wp) < W)).astype(jnp.float32)
    mask = mask.reshape(1, HWp)

    out = _fused_conv_norm_act_conv(xp, w1t, gam, bet, w2, b2, mask,
                                    D=D, H=H, W=W, Hp=Hp, Wp=Wp,
                                    compute_dtype=compute_dtype)

    # Drop the H/W halo lanes; the result is already channel-major, so the
    # slice / axis reorder fuses into the pixel-shuffle copy in XLA.
    # TODO(synk): the pixel-shuffle permutation itself stays in XLA (pure data
    # movement, no clean in-kernel equivalent without a scatter writeback).
    o = out.reshape(N, D, Co, Hp, Wp)[:, :, :, :H, :W]
    o = jnp.transpose(o, (0, 2, 1, 3, 4))                 # (N, Co, D, H, W)
    return _pixel_shuffle_nd_3d(o, r)


# ----------------------------------------------------------------------------
# Pure-JAX reference (for correctness check)
# ----------------------------------------------------------------------------
def _reference_forward(x, w_conv1, gamma, beta, w_conv2, b_conv2, r):
    dn = ("NCDHW", "OIDHW", "NCDHW")
    h = lax.conv_general_dilated(x, w_conv1, (1, 1, 1), "SAME",
                                 dimension_numbers=dn,
                                 precision=lax.Precision.HIGHEST)
    mean = h.mean(axis=(2, 3, 4), keepdims=True)
    var = ((h - mean) ** 2).mean(axis=(2, 3, 4), keepdims=True)
    h = (h - mean) / jnp.sqrt(var + 1e-5)
    h = h * gamma[None, :, None, None, None] + beta[None, :, None, None, None]
    h = jnp.where(h >= 0, h, 0.2 * h)
    Co, Ch = w_conv2.shape[:2]
    o = lax.conv_general_dilated(h, w_conv2.reshape(Co, Ch, 1, 1, 1),
                                 (1, 1, 1), "VALID", dimension_numbers=dn,
                                 precision=lax.Precision.HIGHEST)
    o = o + b_conv2[None, :, None, None, None]
    return _pixel_shuffle_nd_3d(o, r)


# ----------------------------------------------------------------------------
if __name__ == "__main__":
    N, C_in, D, H, W = 2, 4, 8, 8, 8
    hidden = C_in                    # hidden_channels=None -> in_channels
    out_channels = 2
    r = 2
    Co = out_channels * r ** 3

    key = jax.random.PRNGKey(0)
    k0, k1, k2, k3 = jax.random.split(key, 4)
    x = jax.random.normal(k0, (N, C_in, D, H, W), dtype=jnp.float32)
    w_conv1 = 0.1 * jax.random.normal(k1, (hidden, C_in, 3, 3, 3), jnp.float32)
    w_conv2 = 0.1 * jax.random.normal(k2, (Co, hidden), jnp.float32)
    b_conv2 = 0.1 * jax.random.normal(k3, (Co,), jnp.float32)
    gamma = jnp.ones((hidden,), jnp.float32)     # InstanceNorm3d affine init
    beta = jnp.zeros((hidden,), jnp.float32)

    expected_shape = (N, out_channels, D * r, H * r, W * r)
    ref = jax.block_until_ready(
        _reference_forward(x, w_conv1, gamma, beta, w_conv2, b_conv2, r))

    # f32 MXU-input path: tight structural check.
    fwd_f32 = jax.jit(functools.partial(conv_pixel_shuffle_lite3d, r=r,
                                        compute_dtype=jnp.float32))
    out_f32 = jax.block_until_ready(
        fwd_f32(x, w_conv1, gamma, beta, w_conv2, b_conv2))
    assert out_f32.shape == expected_shape, (out_f32.shape, expected_shape)
    assert jnp.allclose(out_f32, ref, atol=1e-3, rtol=1e-3), float(
        jnp.max(jnp.abs(out_f32 - ref)))

    # bf16 MXU-input / f32-accumulate path (default; halves HBM traffic).
    fwd_bf16 = jax.jit(functools.partial(conv_pixel_shuffle_lite3d, r=r,
                                         compute_dtype=jnp.bfloat16))
    out_bf16 = jax.block_until_ready(
        fwd_bf16(x, w_conv1, gamma, beta, w_conv2, b_conv2))
    assert out_bf16.shape == expected_shape, (out_bf16.shape, expected_shape)
    assert jnp.allclose(out_bf16, ref, atol=5e-2, rtol=5e-2), float(
        jnp.max(jnp.abs(out_bf16 - ref)))

    print("KERNEL_OK")
</pallas_src>

<mosaic_0001>
module attributes {stable_mosaic.version = 11 : i64} {
  func.func @kernel(%arg0: i32, %arg1: i32, %arg2: i32, %arg3: memref<1x10x4x128xf32, #tpu.memory_space<vmem>>, %arg4: memref<27x4x4xf32, #tpu.memory_space<vmem>>, %arg5: memref<4x1xf32, #tpu.memory_space<vmem>>, %arg6: memref<4x1xf32, #tpu.memory_space<vmem>>, %arg7: memref<16x4xf32, #tpu.memory_space<vmem>>, %arg8: memref<16x1xf32, #tpu.memory_space<vmem>>, %arg9: memref<1x100xf32, #tpu.memory_space<vmem>>, %arg10: memref<1x1x16x100xf32, #tpu.memory_space<vmem>>, %arg11: memref<4x1xf32, #tpu.memory_space<vmem>>, %arg12: memref<4x1xf32, #tpu.memory_space<vmem>>, %arg13: memref<4x1xf32, #tpu.memory_space<vmem>>, %arg14: memref<4x1xf32, #tpu.memory_space<vmem>>, %arg15: memref<8x4x100xf32, #tpu.memory_space<vmem>>) attributes {dimension_semantics = [#tpu.dimension_semantics<parallel>, #tpu.dimension_semantics<arbitrary>, #tpu.dimension_semantics<arbitrary>], iteration_bounds = array<i64: 2, 2, 8>, scalar_prefetch = 0 : i64, scratch_operands = 5 : i64, tpu.core_type = #tpu.core_type<tc>, window_params = [{transform_indices = @transform_0, window_bounds = array<i64: 1, 10, 4, 128>}, {pipeline_mode = #tpu.pipeline_mode<synchronous>, transform_indices = @transform_1, window_bounds = array<i64: 27, 4, 4>}, {pipeline_mode = #tpu.pipeline_mode<synchronous>, transform_indices = @transform_2, window_bounds = array<i64: 4, 1>}, {pipeline_mode = #tpu.pipeline_mode<synchronous>, transform_indices = @transform_3, window_bounds = array<i64: 4, 1>}, {pipeline_mode = #tpu.pipeline_mode<synchronous>, transform_indices = @transform_4, window_bounds = array<i64: 16, 4>}, {pipeline_mode = #tpu.pipeline_mode<synchronous>, transform_indices = @transform_5, window_bounds = array<i64: 16, 1>}, {pipeline_mode = #tpu.pipeline_mode<synchronous>, transform_indices = @transform_6, window_bounds = array<i64: 1, 100>}, {transform_indices = @transform_7, window_bounds = array<i64: 1, 1, 16, 100>}]} {
    %c0_i32 = arith.constant 0 : i32
    %0 = arith.cmpi eq, %arg1, %c0_i32 : i32
    %c0_i32_0 = arith.constant 0 : i32
    %1 = arith.cmpi eq, %arg2, %c0_i32_0 : i32
    %2 = arith.andi %0, %1 : i1
    %3 = arith.extui %2 : i1 to i32
    %c0_i32_1 = arith.constant 0 : i32
    %4 = arith.cmpi ne, %3, %c0_i32_1 : i32
    scf.if %4 {
      %cst = arith.constant 0.000000e+00 : f32
      %16 = vector.broadcast %cst : f32 to vector<4x1xf32>
      %c0 = arith.constant 0 : index
      %c0_7 = arith.constant 0 : index
      %17 = vector.load %arg11[%c0, %c0_7] : memref<4x1xf32, #tpu.memory_space<vmem>>, vector<4x1xf32>
      tpu.vector_store %arg11[%c0, %c0_7], %16 {strides = array<i32>} : memref<4x1xf32, #tpu.memory_space<vmem>>, vector<4x1xf32>,
      %cst_8 = arith.constant 0.000000e+00 : f32
      %18 = vector.broadcast %cst_8 : f32 to vector<4x1xf32>
      %c0_9 = arith.constant 0 : index
      %c0_10 = arith.constant 0 : index
      %19 = vector.load %arg12[%c0_9, %c0_10] : memref<4x1xf32, #tpu.memory_space<vmem>>, vector<4x1xf32>
      tpu.vector_store %arg12[%c0_9, %c0_10], %18 {strides = array<i32>} : memref<4x1xf32, #tpu.memory_space<vmem>>, vector<4x1xf32>,
    } else {
    }
    %c0_i32_2 = arith.constant 0 : i32
    %5 = arith.cmpi eq, %arg1, %c0_i32_2 : i32
    %6 = arith.extui %5 : i1 to i32
    %c0_i32_3 = arith.constant 0 : i32
    %7 = arith.cmpi ne, %6, %c0_i32_3 : i32
    scf.if %7 {
      %cst = arith.constant 0.000000e+00 : f32
      %16 = vector.broadcast %cst : f32 to vector<4x100xf32>
      %c0_i32_7 = arith.constant 0 : i32
      %17 = arith.addi %arg2, %c0_i32_7 : i32
      %c0 = arith.constant 0 : index
      %18 = arith.index_cast %17 : i32 to index
      %c0_8 = arith.constant 0 : index
      %c0_9 = arith.constant 0 : index
      %19 = vector.load %arg3[%c0, %18, %c0_8, %c0_9] : memref<1x10x4x128xf32, #tpu.memory_space<vmem>>, vector<1x1x4x128xf32>
      %20 = vector.shape_cast %19 : vector<1x1x4x128xf32> to vector<4x128xf32>
      %21 = vector.extract_strided_slice %20 {offsets = [0, 0], sizes = [4, 100], strides = [1, 1]} : vector<4x128xf32> to vector<4x100xf32>
      %c0_10 = arith.constant 0 : index
      %c0_11 = arith.constant 0 : index
      %c0_12 = arith.constant 0 : index
      %22 = vector.load %arg4[%c0_10, %c0_11, %c0_12] : memref<27x4x4xf32, #tpu.memory_space<vmem>>, vector<1x4x4xf32>
      %23 = vector.shape_cast %22 : vector<1x4x4xf32> to vector<4x4xf32>
      %cst_13 = arith.constant dense<0.000000e+00> : vector<4x100xf32>
      %24 = tpu.matmul %23, %21, %cst_13 {dimension_numbers = #tpu.dot_dimension_numbers<[1], [0], [0], [1], [0, 0, 1, 1], [], []>} : vector<4x4xf32>, vector<4x100xf32>, vector<4x100xf32> -> vector<4x100xf32>
      %25 = arith.addf %16, %24 : vector<4x100xf32>
      %26 = vector.extract_strided_slice %20 {offsets = [0, 1], sizes = [4, 100], strides = [1, 1]} : vector<4x128xf32> to vector<4x100xf32>
      %c1 = arith.constant 1 : index
      %c0_14 = arith.constant 0 : index
      %c0_15 = arith.constant 0 : index
      %27 = vector.load %arg4[%c1, %c0_14, %c0_15] : memref<27x4x4xf32, #tpu.memory_space<vmem>>, vector<1x4x4xf32>
      %28 = vector.shape_cast %27 : vector<1x4x4xf32> to vector<4x4xf32>
      %cst_16 = arith.constant dense<0.000000e+00> : vector<4x100xf32>
      %29 = tpu.matmul %28, %26, %cst_16 {dimension_numbers = #tpu.dot_dimension_numbers<[1], [0], [0], [1], [0, 0, 1, 1], [], []>} : vector<4x4xf32>, vector<4x100xf32>, vector<4x100xf32> -> vector<4x100xf32>
      %30 = arith.addf %25, %29 : vector<4x100xf32>
      %31 = vector.extract_strided_slice %20 {offsets = [0, 2], sizes = [4, 100], strides = [1, 1]} : vector<4x128xf32> to vector<4x100xf32>
      %c2 = arith.constant 2 : index
      %c0_17 = arith.constant 0 : index
      %c0_18 = arith.constant 0 : index
      %32 = vector.load %arg4[%c2, %c0_17, %c0_18] : memref<27x4x4xf32, #tpu.memory_space<vmem>>, vector<1x4x4xf32>
      %33 = vector.shape_cast %32 : vector<1x4x4xf32> to vector<4x4xf32>
      %cst_19 = arith.constant dense<0.000000e+00> : vector<4x100xf32>
      %34 = tpu.matmul %33, %31, %cst_19 {dimension_numbers = #tpu.dot_dimension_numbers<[1], [0], [0], [1], [0, 0, 1, 1], [], []>} : vector<4x4xf32>, vector<4x100xf32>, vector<4x100xf32> -> vector<4x100xf32>
      %35 = arith.addf %30, %34 : vector<4x100xf32>
      %36 = vector.extract_strided_slice %20 {offsets = [0, 10], sizes = [4, 100], strides = [1, 1]} : vector<4x128xf32> to vector<4x100xf32>
      %c3 = arith.constant 3 : index
      %c0_20 = arith.constant 0 : index
      %c0_21 = arith.constant 0 : index
      %37 = vector.load %arg4[%c3, %c0_20, %c0_21] : memref<27x4x4xf32, #tpu.memory_space<vmem>>, vector<1x4x4xf32>
      %38 = vector.shape_cast %37 : vector<1x4x4xf32> to vector<4x4xf32>
      %cst_22 = arith.constant dense<0.000000e+00> : vector<4x100xf32>
      %39 = tpu.matmul %38, %36, %cst_22 {dimension_numbers = #tpu.dot_dimension_numbers<[1], [0], [0], [1], [0, 0, 1, 1], [], []>} : vector<4x4xf32>, vector<4x100xf32>, vector<4x100xf32> -> vector<4x100xf32>
      %40 = arith.addf %35, %39 : vector<4x100xf32>
      %41 = vector.extract_strided_slice %20 {offsets = [0, 11], sizes = [4, 100], strides = [1, 1]} : vector<4x128xf32> to vector<4x100xf32>
      %c4 = arith.constant 4 : index
      %c0_23 = arith.constant 0 : index
      %c0_24 = arith.constant 0 : index
      %42 = vector.load %arg4[%c4, %c0_23, %c0_24] : memref<27x4x4xf32, #tpu.memory_space<vmem>>, vector<1x4x4xf32>
      %43 = vector.shape_cast %42 : vector<1x4x4xf32> to vector<4x4xf32>
      %cst_25 = arith.constant dense<0.000000e+00> : vector<4x100xf32>
      %44 = tpu.matmul %43, %41, %cst_25 {dimension_numbers = #tpu.dot_dimension_numbers<[1], [0], [0], [1], [0, 0, 1, 1], [], []>} : vector<4x4xf32>, vector<4x100xf32>, vector<4x100xf32> -> vector<4x100xf32>
      %45 = arith.addf %40, %44 : vector<4x100xf32>
      %46 = vector.extract_strided_slice %20 {offsets = [0, 12], sizes = [4, 100], strides = [1, 1]} : vector<4x128xf32> to vector<4x100xf32>
      %c5 = arith.constant 5 : index
      %c0_26 = arith.constant 0 : index
      %c0_27 = arith.constant 0 : index
      %47 = vector.load %arg4[%c5, %c0_26, %c0_27] : memref<27x4x4xf32, #tpu.memory_space<vmem>>, vector<1x4x4xf32>
      %48 = vector.shape_cast %47 : vector<1x4x4xf32> to vector<4x4xf32>
      %cst_28 = arith.constant dense<0.000000e+00> : vector<4x100xf32>
      %49 = tpu.matmul %48, %46, %cst_28 {dimension_numbers = #tpu.dot_dimension_numbers<[1], [0], [0], [1], [0, 0, 1, 1], [], []>} : vector<4x4xf32>, vector<4x100xf32>, vector<4x100xf32> -> vector<4x100xf32>
      %50 = arith.addf %45, %49 : vector<4x100xf32>
      %51 = vector.extract_strided_slice %20 {offsets = [0, 20], sizes = [4, 100], strides = [1, 1]} : vector<4x128xf32> to vector<4x100xf32>
      %c6 = arith.constant 6 : index
      %c0_29 = arith.constant 0 : index
      %c0_30 = arith.constant 0 : index
      %52 = vector.load %arg4[%c6, %c0_29, %c0_30] : memref<27x4x4xf32, #tpu.memory_space<vmem>>, vector<1x4x4xf32>
      %53 = vector.shape_cast %52 : vector<1x4x4xf32> to vector<4x4xf32>
      %cst_31 = arith.constant dense<0.000000e+00> : vector<4x100xf32>
      %54 = tpu.matmul %53, %51, %cst_31 {dimension_numbers = #tpu.dot_dimension_numbers<[1], [0], [0], [1], [0, 0, 1, 1], [], []>} : vector<4x4xf32>, vector<4x100xf32>, vector<4x100xf32> -> vector<4x100xf32>
      %55 = arith.addf %50, %54 : vector<4x100xf32>
      %56 = vector.extract_strided_slice %20 {offsets = [0, 21], sizes = [4, 100], strides = [1, 1]} : vector<4x128xf32> to vector<4x100xf32>
      %c7 = arith.constant 7 : index
      %c0_32 = arith.constant 0 : index
      %c0_33 = arith.constant 0 : index
      %57 = vector.load %arg4[%c7, %c0_32, %c0_33] : memref<27x4x4xf32, #tpu.memory_space<vmem>>, vector<1x4x4xf32>
      %58 = vector.shape_cast %57 : vector<1x4x4xf32> to vector<4x4xf32>
      %cst_34 = arith.constant dense<0.000000e+00> : vector<4x100xf32>
      %59 = tpu.matmul %58, %56, %cst_34 {dimension_numbers = #tpu.dot_dimension_numbers<[1], [0], [0], [1], [0, 0, 1, 1], [], []>} : vector<4x4xf32>, vector<4x100xf32>, vector<4x100xf32> -> vector<4x100xf32>
      %60 = arith.addf %55, %59 : vector<4x100xf32>
      %61 = vector.extract_strided_slice %20 {offsets = [0, 22], sizes = [4, 100], strides = [1, 1]} : vector<4x128xf32> to vector<4x100xf32>
      %c8 = arith.constant 8 : index
      %c0_35 = arith.constant 0 : index
      %c0_36 = arith.constant 0 : index
      %62 = vector.load %arg4[%c8, %c0_35, %c0_36] : memref<27x4x4xf32, #tpu.memory_space<vmem>>, vector<1x4x4xf32>
      %63 = vector.shape_cast %62 : vector<1x4x4xf32> to vector<4x4xf32>
      %cst_37 = arith.constant dense<0.000000e+00> : vector<4x100xf32>
      %64 = tpu.matmul %63, %61, %cst_37 {dimension_numbers = #tpu.dot_dimension_numbers<[1], [0], [0], [1], [0, 0, 1, 1], [], []>} : vector<4x4xf32>, vector<4x100xf32>, vector<4x100xf32> -> vector<4x100xf32>
      %65 = arith.addf %60, %64 : vector<4x100xf32>
      %c1_i32_38 = arith.constant 1 : i32
      %66 = arith.addi %arg2, %c1_i32_38 : i32
      %c0_39 = arith.constant 0 : index
      %67 = arith.index_cast %66 : i32 to index
      %c0_40 = arith.constant 0 : index
      %c0_41 = arith.constant 0 : index
      %68 = vector.load %arg3[%c0_39, %67, %c0_40, %c0_41] : memref<1x10x4x128xf32, #tpu.memory_space<vmem>>, vector<1x1x4x128xf32>
      %69 = vector.shape_cast %68 : vector<1x1x4x128xf32> to vector<4x128xf32>
      %70 = vector.extract_strided_slice %69 {offsets = [0, 0], sizes = [4, 100], strides = [1, 1]} : vector<4x128xf32> to vector<4x100xf32>
      %c9 = arith.constant 9 : index
      %c0_42 = arith.constant 0 : index
      %c0_43 = arith.constant 0 : index
      %71 = vector.load %arg4[%c9, %c0_42, %c0_43] : memref<27x4x4xf32, #tpu.memory_space<vmem>>, vector<1x4x4xf32>
      %72 = vector.shape_cast %71 : vector<1x4x4xf32> to vector<4x4xf32>
      %cst_44 = arith.constant dense<0.000000e+00> : vector<4x100xf32>
      %73 = tpu.matmul %72, %70, %cst_44 {dimension_numbers = #tpu.dot_dimension_numbers<[1], [0], [0], [1], [0, 0, 1, 1], [], []>} : vector<4x4xf32>, vector<4x100xf32>, vector<4x100xf32> -> vector<4x100xf32>
      %74 = arith.addf %65, %73 : vector<4x100xf32>
      %75 = vector.extract_strided_slice %69 {offsets = [0, 1], sizes = [4, 100], strides = [1, 1]} : vector<4x128xf32> to vector<4x100xf32>
      %c10 = arith.constant 10 : index
      %c0_45 = arith.constant 0 : index
      %c0_46 = arith.constant 0 : index
      %76 = vector.load %arg4[%c10, %c0_45, %c0_46] : memref<27x4x4xf32, #tpu.memory_space<vmem>>, vector<1x4x4xf32>
      %77 = vector.shape_cast %76 : vector<1x4x4xf32> to vector<4x4xf32>
      %cst_47 = arith.constant dense<0.000000e+00> : vector<4x100xf32>
      %78 = tpu.matmul %77, %75, %cst_47 {dimension_numbers = #tpu.dot_dimension_numbers<[1], [0], [0], [1], [0, 0, 1, 1], [], []>} : vector<4x4xf32>, vector<4x100xf32>, vector<4x100xf32> -> vector<4x100xf32>
      %79 = arith.addf %74, %78 : vector<4x100xf32>
      %80 = vector.extract_strided_slice %69 {offsets = [0, 2], sizes = [4, 100], strides = [1, 1]} : vector<4x128xf32> to vector<4x100xf32>
      %c11 = arith.constant 11 : index
      %c0_48 = arith.constant 0 : index
      %c0_49 = arith.constant 0 : index
      %81 = vector.load %arg4[%c11, %c0_48, %c0_49] : memref<27x4x4xf32, #tpu.memory_space<vmem>>, vector<1x4x4xf32>
      %82 = vector.shape_cast %81 : vector<1x4x4xf32> to vector<4x4xf32>
      %cst_50 = arith.constant dense<0.000000e+00> : vector<4x100xf32>
      %83 = tpu.matmul %82, %80, %cst_50 {dimension_numbers = #tpu.dot_dimension_numbers<[1], [0], [0], [1], [0, 0, 1, 1], [], []>} : vector<4x4xf32>, vector<4x100xf32>, vector<4x100xf32> -> vector<4x100xf32>
      %84 = arith.addf %79, %83 : vector<4x100xf32>
      %85 = vector.extract_strided_slice %69 {offsets = [0, 10], sizes = [4, 100], strides = [1, 1]} : vector<4x128xf32> to vector<4x100xf32>
      %c12 = arith.constant 12 : index
      %c0_51 = arith.constant 0 : index
      %c0_52 = arith.constant 0 : index
      %86 = vector.load %arg4[%c12, %c0_51, %c0_52] : memref<27x4x4xf32, #tpu.memory_space<vmem>>, vector<1x4x4xf32>
      %87 = vector.shape_cast %86 : vector<1x4x4xf32> to vector<4x4xf32>
      %cst_53 = arith.constant dense<0.000000e+00> : vector<4x100xf32>
      %88 = tpu.matmul %87, %85, %cst_53 {dimension_numbers = #tpu.dot_dimension_numbers<[1], [0], [0], [1], [0, 0, 1, 1], [], []>} : vector<4x4xf32>, vector<4x100xf32>, vector<4x100xf32> -> vector<4x100xf32>
      %89 = arith.addf %84, %88 : vector<4x100xf32>
      %90 = vector.extract_strided_slice %69 {offsets = [0, 11], sizes = [4, 100], strides = [1, 1]} : vector<4x128xf32> to vector<4x100xf32>
      %c13 = arith.constant 13 : index
      %c0_54 = arith.constant 0 : index
      %c0_55 = arith.constant 0 : index
      %91 = vector.load %arg4[%c13, %c0_54, %c0_55] : memref<27x4x4xf32, #tpu.memory_space<vmem>>, vector<1x4x4xf32>
      %92 = vector.shape_cast %91 : vector<1x4x4xf32> to vector<4x4xf32>
      %cst_56 = arith.constant dense<0.000000e+00> : vector<4x100xf32>
      %93 = tpu.matmul %92, %90, %cst_56 {dimension_numbers = #tpu.dot_dimension_numbers<[1], [0], [0], [1], [0, 0, 1, 1], [], []>} : vector<4x4xf32>, vector<4x100xf32>, vector<4x100xf32> -> vector<4x100xf32>
      %94 = arith.addf %89, %93 : vector<4x100xf32>
      %95 = vector.extract_strided_slice %69 {offsets = [0, 12], sizes = [4, 100], strides = [1, 1]} : vector<4x128xf32> to vector<4x100xf32>
      %c14 = arith.constant 14 : index
      %c0_57 = arith.constant 0 : index
      %c0_58 = arith.constant 0 : index
      %96 = vector.load %arg4[%c14, %c0_57, %c0_58] : memref<27x4x4xf32, #tpu.memory_space<vmem>>, vector<1x4x4xf32>
      %97 = vector.shape_cast %96 : vector<1x4x4xf32> to vector<4x4xf32>
      %cst_59 = arith.constant dense<0.000000e+00> : vector<4x100xf32>
      %98 = tpu.matmul %97, %95, %cst_59 {dimension_numbers = #tpu.dot_dimension_numbers<[1], [0], [0], [1], [0, 0, 1, 1], [], []>} : vector<4x4xf32>, vector<4x100xf32>, vector<4x100xf32> -> vector<4x100xf32>
      %99 = arith.addf %94, %98 : vector<4x100xf32>
      %100 = vector.extract_strided_slice %69 {offsets = [0, 20], sizes = [4, 100], strides = [1, 1]} : vector<4x128xf32> to vector<4x100xf32>
      %c15 = arith.constant 15 : index
      %c0_60 = arith.constant 0 : index
      %c0_61 = arith.constant 0 : index
      %101 = vector.load %arg4[%c15, %c0_60, %c0_61] : memref<27x4x4xf32, #tpu.memory_space<vmem>>, vector<1x4x4xf32>
      %102 = vector.shape_cast %101 : vector<1x4x4xf32> to vector<4x4xf32>
      %cst_62 = arith.constant dense<0.000000e+00> : vector<4x100xf32>
      %103 = tpu.matmul %102, %100, %cst_62 {dimension_numbers = #tpu.dot_dimension_numbers<[1], [0], [0], [1], [0, 0, 1, 1], [], []>} : vector<4x4xf32>, vector<4x100xf32>, vector<4x100xf32> -> vector<4x100xf32>
      %104 = arith.addf %99, %103 : vector<4x100xf32>
      %105 = vector.extract_strided_slice %69 {offsets = [0, 21], sizes = [4, 100], strides = [1, 1]} : vector<4x128xf32> to vector<4x100xf32>
      %c16 = arith.constant 16 : index
      %c0_63 = arith.constant 0 : index
      %c0_64 = arith.constant 0 : index
      %106 = vector.load %arg4[%c16, %c0_63, %c0_64] : memref<27x4x4xf32, #tpu.memory_space<vmem>>, vector<1x4x4xf32>
      %107 = vector.shape_cast %106 : vector<1x4x4xf32> to vector<4x4xf32>
      %cst_65 = arith.constant dense<0.000000e+00> : vector<4x100xf32>
      %108 = tpu.matmul %107, %105, %cst_65 {dimension_numbers = #tpu.dot_dimension_numbers<[1], [0], [0], [1], [0, 0, 1, 1], [], []>} : vector<4x4xf32>, vector<4x100xf32>, vector<4x100xf32> -> vector<4x100xf32>
      %109 = arith.addf %104, %108 : vector<4x100xf32>
      %110 = vector.extract_strided_slice %69 {offsets = [0, 22], sizes = [4, 100], strides = [1, 1]} : vector<4x128xf32> to vector<4x100xf32>
      %c17 = arith.constant 17 : index
      %c0_66 = arith.constant 0 : index
      %c0_67 = arith.constant 0 : index
      %111 = vector.load %arg4[%c17, %c0_66, %c0_67] : memref<27x4x4xf32, #tpu.memory_space<vmem>>, vector<1x4x4xf32>
      %112 = vector.shape_cast %111 : vector<1x4x4xf32> to vector<4x4xf32>
      %cst_68 = arith.constant dense<0.000000e+00> : vector<4x100xf32>
      %113 = tpu.matmul %112, %110, %cst_68 {dimension_numbers = #tpu.dot_dimension_numbers<[1], [0], [0], [1], [0, 0, 1, 1], [], []>} : vector<4x4xf32>, vector<4x100xf32>, vector<4x100xf32> -> vector<4x100xf32>
      %114 = arith.addf %109, %113 : vector<4x100xf32>
      %c2_i32 = arith.constant 2 : i32
      %115 = arith.addi %arg2, %c2_i32 : i32
      %c0_69 = arith.constant 0 : index
      %116 = arith.index_cast %115 : i32 to index
      %c0_70 = arith.constant 0 : index
      %c0_71 = arith.constant 0 : index
      %117 = vector.load %arg3[%c0_69, %116, %c0_70, %c0_71] : memref<1x10x4x128xf32, #tpu.memory_space<vmem>>, vector<1x1x4x128xf32>
      %118 = vector.shape_cast %117 : vector<1x1x4x128xf32> to vector<4x128xf32>
      %119 = vector.extract_strided_slice %118 {offsets = [0, 0], sizes = [4, 100], strides = [1, 1]} : vector<4x128xf32> to vector<4x100xf32>
      %c18 = arith.constant 18 : index
      %c0_72 = arith.constant 0 : index
      %c0_73 = arith.constant 0 : index
      %120 = vector.load %arg4[%c18, %c0_72, %c0_73] : memref<27x4x4xf32, #tpu.memory_space<vmem>>, vector<1x4x4xf32>
      %121 = vector.shape_cast %120 : vector<1x4x4xf32> to vector<4x4xf32>
      %cst_74 = arith.constant dense<0.000000e+00> : vector<4x100xf32>
      %122 = tpu.matmul %121, %119, %cst_74 {dimension_numbers = #tpu.dot_dimension_numbers<[1], [0], [0], [1], [0, 0, 1, 1], [], []>} : vector<4x4xf32>, vector<4x100xf32>, vector<4x100xf32> -> vector<4x100xf32>
      %123 = arith.addf %114, %122 : vector<4x100xf32>
      %124 = vector.extract_strided_slice %118 {offsets = [0, 1], sizes = [4, 100], strides = [1, 1]} : vector<4x128xf32> to vector<4x100xf32>
      %c19 = arith.constant 19 : index
      %c0_75 = arith.constant 0 : index
      %c0_76 = arith.constant 0 : index
      %125 = vector.load %arg4[%c19, %c0_75, %c0_76] : memref<27x4x4xf32, #tpu.memory_space<vmem>>, vector<1x4x4xf32>
      %126 = vector.shape_cast %125 : vector<1x4x4xf32> to vector<4x4xf32>
      %cst_77 = arith.constant dense<0.000000e+00> : vector<4x100xf32>
      %127 = tpu.matmul %126, %124, %cst_77 {dimension_numbers = #tpu.dot_dimension_numbers<[1], [0], [0], [1], [0, 0, 1, 1], [], []>} : vector<4x4xf32>, vector<4x100xf32>, vector<4x100xf32> -> vector<4x100xf32>
      %128 = arith.addf %123, %127 : vector<4x100xf32>
      %129 = vector.extract_strided_slice %118 {offsets = [0, 2], sizes = [4, 100], strides = [1, 1]} : vector<4x128xf32> to vector<4x100xf32>
      %c20 = arith.constant 20 : index
      %c0_78 = arith.constant 0 : index
      %c0_79 = arith.constant 0 : index
      %130 = vector.load %arg4[%c20, %c0_78, %c0_79] : memref<27x4x4xf32, #tpu.memory_space<vmem>>, vector<1x4x4xf32>
      %131 = vector.shape_cast %130 : vector<1x4x4xf32> to vector<4x4xf32>
      %cst_80 = arith.constant dense<0.000000e+00> : vector<4x100xf32>
      %132 = tpu.matmul %131, %129, %cst_80 {dimension_numbers = #tpu.dot_dimension_numbers<[1], [0], [0], [1], [0, 0, 1, 1], [], []>} : vector<4x4xf32>, vector<4x100xf32>, vector<4x100xf32> -> vector<4x100xf32>
      %133 = arith.addf %128, %132 : vector<4x100xf32>
      %134 = vector.extract_strided_slice %118 {offsets = [0, 10], sizes = [4, 100], strides = [1, 1]} : vector<4x128xf32> to vector<4x100xf32>
      %c21 = arith.constant 21 : index
      %c0_81 = arith.constant 0 : index
      %c0_82 = arith.constant 0 : index
      %135 = vector.load %arg4[%c21, %c0_81, %c0_82] : memref<27x4x4xf32, #tpu.memory_space<vmem>>, vector<1x4x4xf32>
      %136 = vector.shape_cast %135 : vector<1x4x4xf32> to vector<4x4xf32>
      %cst_83 = arith.constant dense<0.000000e+00> : vector<4x100xf32>
      %137 = tpu.matmul %136, %134, %cst_83 {dimension_numbers = #tpu.dot_dimension_numbers<[1], [0], [0], [1], [0, 0, 1, 1], [], []>} : vector<4x4xf32>, vector<4x100xf32>, vector<4x100xf32> -> vector<4x100xf32>
      %138 = arith.addf %133, %137 : vector<4x100xf32>
      %139 = vector.extract_strided_slice %118 {offsets = [0, 11], sizes = [4, 100], strides = [1, 1]} : vector<4x128xf32> to vector<4x100xf32>
      %c22 = arith.constant 22 : index
      %c0_84 = arith.constant 0 : index
      %c0_85 = arith.constant 0 : index
      %140 = vector.load %arg4[%c22, %c0_84, %c0_85] : memref<27x4x4xf32, #tpu.memory_space<vmem>>, vector<1x4x4xf32>
      %141 = vector.shape_cast %140 : vector<1x4x4xf32> to vector<4x4xf32>
      %cst_86 = arith.constant dense<0.000000e+00> : vector<4x100xf32>
      %142 = tpu.matmul %141, %139, %cst_86 {dimension_numbers = #tpu.dot_dimension_numbers<[1], [0], [0], [1], [0, 0, 1, 1], [], []>} : vector<4x4xf32>, vector<4x100xf32>, vector<4x100xf32> -> vector<4x100xf32>
      %143 = arith.addf %138, %142 : vector<4x100xf32>
      %144 = vector.extract_strided_slice %118 {offsets = [0, 12], sizes = [4, 100], strides = [1, 1]} : vector<4x128xf32> to vector<4x100xf32>
      %c23 = arith.constant 23 : index
      %c0_87 = arith.constant 0 : index
      %c0_88 = arith.constant 0 : index
      %145 = vector.load %arg4[%c23, %c0_87, %c0_88] : memref<27x4x4xf32, #tpu.memory_space<vmem>>, vector<1x4x4xf32>
      %146 = vector.shape_cast %145 : vector<1x4x4xf32> to vector<4x4xf32>
      %cst_89 = arith.constant dense<0.000000e+00> : vector<4x100xf32>
      %147 = tpu.matmul %146, %144, %cst_89 {dimension_numbers = #tpu.dot_dimension_numbers<[1], [0], [0], [1], [0, 0, 1, 1], [], []>} : vector<4x4xf32>, vector<4x100xf32>, vector<4x100xf32> -> vector<4x100xf32>
      %148 = arith.addf %143, %147 : vector<4x100xf32>
      %149 = vector.extract_strided_slice %118 {offsets = [0, 20], sizes = [4, 100], strides = [1, 1]} : vector<4x128xf32> to vector<4x100xf32>
      %c24 = arith.constant 24 : index
      %c0_90 = arith.constant 0 : index
      %c0_91 = arith.constant 0 : index
      %150 = vector.load %arg4[%c24, %c0_90, %c0_91] : memref<27x4x4xf32, #tpu.memory_space<vmem>>, vector<1x4x4xf32>
      %151 = vector.shape_cast %150 : vector<1x4x4xf32> to vector<4x4xf32>
      %cst_92 = arith.constant dense<0.000000e+00> : vector<4x100xf32>
      %152 = tpu.matmul %151, %149, %cst_92 {dimension_numbers = #tpu.dot_dimension_numbers<[1], [0], [0], [1], [0, 0, 1, 1], [], []>} : vector<4x4xf32>, vector<4x100xf32>, vector<4x100xf32> -> vector<4x100xf32>
      %153 = arith.addf %148, %152 : vector<4x100xf32>
      %154 = vector.extract_strided_slice %118 {offsets = [0, 21], sizes = [4, 100], strides = [1, 1]} : vector<4x128xf32> to vector<4x100xf32>
      %c25 = arith.constant 25 : index
      %c0_93 = arith.constant 0 : index
      %c0_94 = arith.constant 0 : index
      %155 = vector.load %arg4[%c25, %c0_93, %c0_94] : memref<27x4x4xf32, #tpu.memory_space<vmem>>, vector<1x4x4xf32>
      %156 = vector.shape_cast %155 : vector<1x4x4xf32> to vector<4x4xf32>
      %cst_95 = arith.constant dense<0.000000e+00> : vector<4x100xf32>
      %157 = tpu.matmul %156, %154, %cst_95 {dimension_numbers = #tpu.dot_dimension_numbers<[1], [0], [0], [1], [0, 0, 1, 1], [], []>} : vector<4x4xf32>, vector<4x100xf32>, vector<4x100xf32> -> vector<4x100xf32>
      %158 = arith.addf %153, %157 : vector<4x100xf32>
      %159 = vector.extract_strided_slice %118 {offsets = [0, 22], sizes = [4, 100], strides = [1, 1]} : vector<4x128xf32> to vector<4x100xf32>
      %c26 = arith.constant 26 : index
      %c0_96 = arith.constant 0 : index
      %c0_97 = arith.constant 0 : index
      %160 = vector.load %arg4[%c26, %c0_96, %c0_97] : memref<27x4x4xf32, #tpu.memory_space<vmem>>, vector<1x4x4xf32>
      %161 = vector.shape_cast %160 : vector<1x4x4xf32> to vector<4x4xf32>
      %cst_98 = arith.constant dense<0.000000e+00> : vector<4x100xf32>
      %162 = tpu.matmul %161, %159, %cst_98 {dimension_numbers = #tpu.dot_dimension_numbers<[1], [0], [0], [1], [0, 0, 1, 1], [], []>} : vector<4x4xf32>, vector<4x100xf32>, vector<4x100xf32> -> vector<4x100xf32>
      %163 = arith.addf %158, %162 : vector<4x100xf32>
      %164 = arith.index_cast %arg2 : i32 to index
      %c0_99 = arith.constant 0 : index
      %c0_100 = arith.constant 0 : index
      %165 = vector.load %arg15[%164, %c0_99, %c0_100] : memref<8x4x100xf32, #tpu.memory_space<vmem>>, vector<1x4x100xf32>
      %166 = vector.shape_cast %165 : vector<1x4x100xf32> to vector<4x100xf32>
      %167 = vector.shape_cast %163 : vector<4x100xf32> to vector<1x4x100xf32>
      tpu.vector_store %arg15[%164, %c0_99, %c0_100], %167 {strides = array<i32>} : memref<8x4x100xf32, #tpu.memory_space<vmem>>, vector<1x4x100xf32>,
      %c0_101 = arith.constant 0 : index
      %c0_102 = arith.constant 0 : index
      %168 = vector.load %arg9[%c0_101, %c0_102] : memref<1x100xf32, #tpu.memory_space<vmem>>, vector<1x100xf32>
      %169 = vector.broadcast %168 : vector<1x100xf32> to vector<4x100xf32>
      %170 = arith.mulf %163, %169 : vector<4x100xf32>
      %c0_103 = arith.constant 0 : index
      %c0_104 = arith.constant 0 : index
      %171 = vector.load %arg11[%c0_103, %c0_104] : memref<4x1xf32, #tpu.memory_space<vmem>>, vector<4x1xf32>
      %cst_105 = arith.constant dense<0.000000e+00> : vector<4xf32>
      %172 = vector.multi_reduction <add>, %170, %cst_105 [1] : vector<4x100xf32> to vector<4xf32>
      %173 = vector.shape_cast %172 : vector<4xf32> to vector<4x1xf32>
      %174 = arith.addf %171, %173 : vector<4x1xf32>
      %c0_106 = arith.constant 0 : index
      %c0_107 = arith.constant 0 : index
      %175 = vector.load %arg11[%c0_106, %c0_107] : memref<4x1xf32, #tpu.memory_space<vmem>>, vector<4x1xf32>
      tpu.vector_store %arg11[%c0_106, %c0_107], %174 {strides = array<i32>} : memref<4x1xf32, #tpu.memory_space<vmem>>, vector<4x1xf32>,
      %c0_108 = arith.constant 0 : index
      %c0_109 = arith.constant 0 : index
      %176 = vector.load %arg12[%c0_108, %c0_109] : memref<4x1xf32, #tpu.memory_space<vmem>>, vector<4x1xf32>
      %177 = arith.mulf %163, %170 : vector<4x100xf32>
      %cst_110 = arith.constant dense<0.000000e+00> : vector<4xf32>
      %178 = vector.multi_reduction <add>, %177, %cst_110 [1] : vector<4x100xf32> to vector<4xf32>
      %179 = vector.shape_cast %178 : vector<4xf32> to vector<4x1xf32>
      %180 = arith.addf %176, %179 : vector<4x1xf32>
      %c0_111 = arith.constant 0 : index
      %c0_112 = arith.constant 0 : index
      %181 = vector.load %arg12[%c0_111, %c0_112] : memref<4x1xf32, #tpu.memory_space<vmem>>, vector<4x1xf32>
      tpu.vector_store %arg12[%c0_111, %c0_112], %180 {strides = array<i32>} : memref<4x1xf32, #tpu.memory_space<vmem>>, vector<4x1xf32>,
    } else {
    }
    %c0_i32_4 = arith.constant 0 : i32
    %8 = arith.cmpi eq, %arg1, %c0_i32_4 : i32
    %c7_i32 = arith.constant 7 : i32
    %9 = arith.cmpi eq, %arg2, %c7_i32 : i32
    %10 = arith.andi %8, %9 : i1
    %11 = arith.extui %10 : i1 to i32
    %c0_i32_5 = arith.constant 0 : i32
    %12 = arith.cmpi ne, %11, %c0_i32_5 : i32
    scf.if %12 {
      %c0 = arith.constant 0 : index
      %c0_7 = arith.constant 0 : index
      %16 = vector.load %arg11[%c0, %c0_7] : memref<4x1xf32, #tpu.memory_space<vmem>>, vector<4x1xf32>
      %cst = arith.constant 0.001953125 : f32
      %17 = vector.broadcast %cst : f32 to vector<4x1xf32>
      %18 = arith.mulf %16, %17 : vector<4x1xf32>
      %c0_8 = arith.constant 0 : index
      %c0_9 = arith.constant 0 : index
      %19 = vector.load %arg12[%c0_8, %c0_9] : memref<4x1xf32, #tpu.memory_space<vmem>>, vector<4x1xf32>
      %cst_10 = arith.constant 0.001953125 : f32
      %20 = vector.broadcast %cst_10 : f32 to vector<4x1xf32>
      %21 = arith.mulf %19, %20 : vector<4x1xf32>
      %22 = arith.mulf %18, %18 : vector<4x1xf32>
      %23 = arith.subf %21, %22 : vector<4x1xf32>
      %cst_11 = arith.constant 0.000000e+00 : f32
      %24 = vector.broadcast %cst_11 : f32 to vector<4x1xf32>
      %25 = arith.maximumf %23, %24 : vector<4x1xf32>
      %cst_12 = arith.constant 9.99999974E-6 : f32
      %26 = vector.broadcast %cst_12 : f32 to vector<4x1xf32>
      %27 = arith.addf %25, %26 : vector<4x1xf32>
      %28 = math.rsqrt %27 : vector<4x1xf32>
      %c0_13 = arith.constant 0 : index
      %c0_14 = arith.constant 0 : index
      %29 = vector.load %arg5[%c0_13, %c0_14] : memref<4x1xf32, #tpu.memory_space<vmem>>, vector<4x1xf32>
      %30 = arith.mulf %28, %29 : vector<4x1xf32>
      %c0_15 = arith.constant 0 : index
      %c0_16 = arith.constant 0 : index
      %31 = vector.load %arg13[%c0_15, %c0_16] : memref<4x1xf32, #tpu.memory_space<vmem>>, vector<4x1xf32>
      tpu.vector_store %arg13[%c0_15, %c0_16], %30 {strides = array<i32>} : memref<4x1xf32, #tpu.memory_space<vmem>>, vector<4x1xf32>,
      %c0_17 = arith.constant 0 : index
      %c0_18 = arith.constant 0 : index
      %32 = vector.load %arg6[%c0_17, %c0_18] : memref<4x1xf32, #tpu.memory_space<vmem>>, vector<4x1xf32>
      %33 = arith.mulf %18, %30 : vector<4x1xf32>
      %34 = arith.subf %32, %33 : vector<4x1xf32>
      %c0_19 = arith.constant 0 : index
      %c0_20 = arith.constant 0 : index
      %35 = vector.load %arg14[%c0_19, %c0_20] : memref<4x1xf32, #tpu.memory_space<vmem>>, vector<4x1xf32>
      tpu.vector_store %arg14[%c0_19, %c0_20], %34 {strides = array<i32>} : memref<4x1xf32, #tpu.memory_space<vmem>>, vector<4x1xf32>,
    } else {
    }
    %c1_i32 = arith.constant 1 : i32
    %13 = arith.cmpi eq, %arg1, %c1_i32 : i32
    %14 = arith.extui %13 : i1 to i32
    %c0_i32_6 = arith.constant 0 : i32
    %15 = arith.cmpi ne, %14, %c0_i32_6 : i32
    scf.if %15 {
      %16 = arith.index_cast %arg2 : i32 to index
      %c0 = arith.constant 0 : index
      %c0_7 = arith.constant 0 : index
      %17 = vector.load %arg15[%16, %c0, %c0_7] : memref<8x4x100xf32, #tpu.memory_space<vmem>>, vector<1x4x100xf32>
      %18 = vector.shape_cast %17 : vector<1x4x100xf32> to vector<4x100xf32>
      %c0_8 = arith.constant 0 : index
      %c0_9 = arith.constant 0 : index
      %19 = vector.load %arg13[%c0_8, %c0_9] : memref<4x1xf32, #tpu.memory_space<vmem>>, vector<4x1xf32>
      %20 = vector.broadcast %19 : vector<4x1xf32> to vector<4x100xf32>
      %21 = arith.mulf %18, %20 : vector<4x100xf32>
      %c0_10 = arith.constant 0 : index
      %c0_11 = arith.constant 0 : index
      %22 = vector.load %arg14[%c0_10, %c0_11] : memref<4x1xf32, #tpu.memory_space<vmem>>, vector<4x1xf32>
      %23 = vector.broadcast %22 : vector<4x1xf32> to vector<4x100xf32>
      %24 = arith.addf %21, %23 : vector<4x100xf32>
      %cst = arith.constant 2.000000e-01 : f32
      %25 = vector.broadcast %cst : f32 to vector<4x100xf32>
      %26 = arith.mulf %25, %24 : vector<4x100xf32>
      %27 = arith.maximumf %24, %26 : vector<4x100xf32>
      %c0_12 = arith.constant 0 : index
      %c0_13 = arith.constant 0 : index
      %28 = vector.load %arg7[%c0_12, %c0_13] : memref<16x4xf32, #tpu.memory_space<vmem>>, vector<16x4xf32>
      %cst_14 = arith.constant dense<0.000000e+00> : vector<16x100xf32>
      %29 = tpu.matmul %28, %27, %cst_14 {dimension_numbers = #tpu.dot_dimension_numbers<[1], [0], [0], [1], [0, 0, 1, 1], [], []>} : vector<16x4xf32>, vector<4x100xf32>, vector<16x100xf32> -> vector<16x100xf32>
      %c0_15 = arith.constant 0 : index
      %c0_16 = arith.constant 0 : index
      %30 = vector.load %arg8[%c0_15, %c0_16] : memref<16x1xf32, #tpu.memory_space<vmem>>, vector<16x1xf32>
      %31 = vector.broadcast %30 : vector<16x1xf32> to vector<16x100xf32>
      %32 = arith.addf %29, %31 : vector<16x100xf32>
      %c0_17 = arith.constant 0 : index
      %c0_18 = arith.constant 0 : index
      %c0_19 = arith.constant 0 : index
      %c0_20 = arith.constant 0 : index
      %33 = vector.load %arg10[%c0_17, %c0_18, %c0_19, %c0_20] : memref<1x1x16x100xf32, #tpu.memory_space<vmem>>, vector<1x1x16x100xf32>
      %34 = vector.shape_cast %33 : vector<1x1x16x100xf32> to vector<16x100xf32>
      %35 = vector.shape_cast %32 : vector<16x100xf32> to vector<1x1x16x100xf32>
      tpu.vector_store %arg10[%c0_17, %c0_18, %c0_19, %c0_20], %35 {strides = array<i32>} : memref<1x1x16x100xf32, #tpu.memory_space<vmem>>, vector<1x1x16x100xf32>,
    } else {
    }
    return
  }
  func.func @transform_0(%arg0: i32, %arg1: i32, %arg2: i32) -> (i32, i32, i32, i32) {
    %c0_i32 = arith.constant 0 : i32
    %c0_i32_0 = arith.constant 0 : i32
    %c0_i32_1 = arith.constant 0 : i32
    %c0_i32_2 = arith.constant 0 : i32
    return %arg0, %c0_i32, %c0_i32_0, %c0_i32_1 : i32, i32, i32, i32
  }
  func.func @transform_1(%arg0: i32, %arg1: i32, %arg2: i32) -> (i32, i32, i32) {
    %c0_i32 = arith.constant 0 : i32
    %c0_i32_0 = arith.constant 0 : i32
    %c0_i32_1 = arith.constant 0 : i32
    %c0_i32_2 = arith.constant 0 : i32
    return %c0_i32, %c0_i32_0, %c0_i32_1 : i32, i32, i32
  }
  func.func @transform_2(%arg0: i32, %arg1: i32, %arg2: i32) -> (i32, i32) {
    %c0_i32 = arith.constant 0 : i32
    %c0_i32_0 = arith.constant 0 : i32
    %c0_i32_1 = arith.constant 0 : i32
    return %c0_i32, %c0_i32_0 : i32, i32
  }
  func.func @transform_3(%arg0: i32, %arg1: i32, %arg2: i32) -> (i32, i32) {
    %c0_i32 = arith.constant 0 : i32
    %c0_i32_0 = arith.constant 0 : i32
    %c0_i32_1 = arith.constant 0 : i32
    return %c0_i32, %c0_i32_0 : i32, i32
  }
  func.func @transform_4(%arg0: i32, %arg1: i32, %arg2: i32) -> (i32, i32) {
    %c0_i32 = arith.constant 0 : i32
    %c0_i32_0 = arith.constant 0 : i32
    %c0_i32_1 = arith.constant 0 : i32
    return %c0_i32, %c0_i32_0 : i32, i32
  }
  func.func @transform_5(%arg0: i32, %arg1: i32, %arg2: i32) -> (i32, i32) {
    %c0_i32 = arith.constant 0 : i32
    %c0_i32_0 = arith.constant 0 : i32
    %c0_i32_1 = arith.constant 0 : i32
    return %c0_i32, %c0_i32_0 : i32, i32
  }
  func.func @transform_6(%arg0: i32, %arg1: i32, %arg2: i32) -> (i32, i32) {
    %c0_i32 = arith.constant 0 : i32
    %c0_i32_0 = arith.constant 0 : i32
    %c0_i32_1 = arith.constant 0 : i32
    return %c0_i32, %c0_i32_0 : i32, i32
  }
  func.func @transform_7(%arg0: i32, %arg1: i32, %arg2: i32) -> (i32, i32, i32, i32) {
    %0 = arith.muli %arg1, %arg2 : i32
    %c0_i32 = arith.constant 0 : i32
    %c0_i32_0 = arith.constant 0 : i32
    %c0_i32_1 = arith.constant 0 : i32
    return %arg0, %0, %c0_i32, %c0_i32_0 : i32, i32, i32, i32
  }
}

</mosaic_0001>

<bundles_post_ra>
// kernel: conv_pixel_shuffle_lite3d.1
= control target key start
LH: loop header
LB: loop body
LE: loop exit
PB: predicated region body
PF: predicated region fallthrough
CT: control target
= control target key end

     0   :  { %s3254_s24 = smov 0   ;;  %s3256_s25 = smov 0   ;;  %s3620_s0 = inlined_call_operand.vmem [shape: f32[2,10,4,128], index: 0, kind: input, shape index: {}]   ;;  %s3621_s1 = inlined_call_operand.vmem [shape: f32[27,4,4], index: 1, kind: input, shape index: {}]   ;;  %s3622_s2 = inlined_call_operand.vmem [shape: f32[4,1], index: 2, kind: input, shape index: {}]   ;;  %s3623_s3 = inlined_call_operand.vmem [shape: f32[4,1], index: 3, kind: input, shape index: {}]   ;;  %s3624_s4 = inlined_call_operand.vmem [shape: f32[16,4], index: 4, kind: input, shape index: {}]   ;;  %s3625_s5 = inlined_call_operand.vmem [shape: f32[16,1], index: 5, kind: input, shape index: {}]   ;;  %s3626_s6 = inlined_call_operand.vmem [shape: f32[1,100], index: 6, kind: input, shape index: {}]   ;;  %s3627_s7 = inlined_call_operand.vmem [shape: f32[2,8,16,100], index: 7, kind: output, shape index: {}]  }
   0x1   :  { %s3258_s26 = smov 0   ;;  %s3260_s27 = smov 0  }
   0x2   :  { %s3262_s28 = smov 0   ;;  %s3264_s29 = smov 0  }
   0x3   :  { %s3266_s30 = smov 0  }
   0x4 LB: > { %s29_s8 = sadd.s32 1, %s3188_s27  ;;  %s32_s9 = sadd.s32 1, %s3192_s28  ;;  %s3200_s30 = sphi %s3266_s30, %s17_s30   ;;  %s3196_s29 = sphi %s3264_s29, %s3633_s29   ;;  %s3192_s28 = sphi %s3262_s28, %s3632_s28   ;;  %s3188_s27 = sphi %s3260_s27, %s3631_s27   ;;  %s3184_s26 = sphi %s3258_s26, %s3630_s26   ;;  %s3180_s25 = sphi %s3256_s25, %s3629_s25   ;;  %s3176_s24 = sphi %s3254_s24, %s3628_s24  }
   0x5   : > { %p30_p0 = scmp.ge.s32.totalorder %s29_s8, 8  ;;  %p2777_p1 = scmp.ge.s32.totalorder %s3200_s30, 1 }
   0x6   : > { %p260_p2 = scmp.lt.s32.totalorder %s3200_s30, 33  ;;  %s36_s10 = sadd.s32 1, %s3196_s29 }
   0x7   : > { %s3635_s8 = smov (%p30_p0, %s29_s8), 0  ;;  %s3637_s9 = smov (!%p30_p0, %s32_s9), %s3192_s28 }
   0x8   : > { %p261_p3 = pnand %p2777_p1, %p260_p2  ;;  %p34_p4 = scmp.ge.s32.totalorder %s3637_s9, 2 }
   0x9   : > { %p297_p6 = scmp.lt.s32.totalorder (!%p261_p3), %s3184_s26, 1  ;;  %s302_s11 = smul.u32 (!%p261_p3), %s3176_s24, %s3180_s25 }
   0xa   : > { %s3639_s9 = smov (%p34_p4, %s3637_s9), 0  ;;  %s3641_s10 = smov (!%p34_p4, %s36_s10), %s3196_s29 }
   0xb   : > { %p38_p5 = scmp.ge.s32.totalorder %s3641_s10, 2  ;;  %264 = sbr.rel (%p261_p3) target bundleno = 928 (0x3a0), region = 48 }
   0xc   : > { %p313_p7 = scmp.eq.s32.totalorder (!%p261_p3), %s3180_s25, 0  ;;  %p314_p8 = scmp.eq.s32.totalorder (!%p261_p3), %s3176_s24, 0 }
   0xd   : > { %s3643_s10 = smov (%p38_p5, %s3641_s10), 0  ;;  %p305_p9 = scmp.lt.s32.totalorder (!%p261_p3), %s302_s11, 7 }
   0xe   : > { %p315_p10 = pnand (!%p261_p3), %p314_p8, %p313_p7 }
  0x10   : > { %s3645_s26 = smov (!%p297_p6, %s3184_s26), 1  ;;  %s3647_s11 = smov (!%p305_p9, %s302_s11), 7 }
  0x11   : > { %s3073_s12 = smul.u32 40, %s3645_s26  ;;  %s2780_s13 = sshll.u32 %s3645_s26, 4 }
  0x12   : > { %s2779_s17 = sshll.u32 %s3647_s11, 1  ;;  %318 = sbr.rel (%p315_p10) target bundleno = 25 (0x19), region = 52 }
  0x13   : > { %s301_s16 = scalar_lea.vmem %s3620_s0, %s3073_s12  ;;  %s309_s18 = sadd.s32 %s2780_s13, %s2779_s17 }
  0x14   : > { %s2781_s19 = sshll.u32 %s309_s18, 3 }
  0x15   : > { %s3312_s22 = scalar_lea.vmem %s3627_s7, %s2781_s19 }
  0x17   : > { %vm319_vm0 = vcmask 3072   ;;  %v3202_v0 = vmov 0.0  }
  0x18   : > { %320 = vst.msk [vmem:[#allocation2] sm:$0xf] %vm319_vm0, %v3202_v0  ;;  %321 = vst.msk [vmem:[#allocation3] sm:$0xf] %vm319_vm0, %v3202_v0 }
  0x19 PF: > { %p2782_p11 = scmp.ne.s32.totalorder %s3180_s25, 0 }
  0x1a   : > { %s2783_s23 = sshll.u32 (!%p2782_p11), %s3176_s24, 2  ;;  %s3205_s13 = smov (!%p2782_p11), 127  }
  0x1b   : > { %324 = sbr.rel (%p2782_p11) target bundleno = 544 (0x220), region = 56  ;;  %s3318_s26 = scalar_lea.vmem (!%p2782_p11), %s301_s16, %s2783_s23 }
  0x1c   : > { %s3206_s14 = smov (!%p2782_p11), 118   ;;  %s3207_s15 = smov (!%p2782_p11), 126  }
  0x1d   : > { %s3208_s16 = smov (!%p2782_p11), 117   ;;  %s3209_s17 = smov (!%p2782_p11), 116  }
  0x1e   : > { %s3210_s18 = smov (!%p2782_p11), 108   ;;  %s3211_s19 = smov (!%p2782_p11), 107  }
  0x1f   : > { %s3212_s20 = smov (!%p2782_p11), 106  }
  0x20   : > { %v3203_v1 = vmov 0.0   ;;  %vm338_vm1 = vcmask 1043456   ;;  %vm3204_vm2 = vmmov 0   ;;  %v327_v2 = vld [vmem:[%s3318_s26] sm:$0xf]  ;;  %vm334_vm3 = vcmask 31744  }
  0x21   : > { %2933 = vmatprep.subr.mxu0 %v3203_v1  ;;  %2935 = vmatprep.mubr.msk.f32.mxu0 %vm3204_vm2, %v3203_v1  ;;  %v328_v3 = vld [vmem:[%s3621_s1] sm:$0xf]  ;;  %v3338_v4 = vld [vmem:[%s3318_s26 + $0x4] sm:$0xf]  ;;  %v3351_v5 = vld [vmem:[%s3318_s26 + $0x8] sm:$0xf] }
  0x22   : > { %2938 = vmatprep.subr.mxu1 %v3203_v1  ;;  %2940 = vmatprep.mubr.msk.f32.mxu1 %vm3204_vm2, %v3203_v1  ;;  %v2784_v6 = vld [vmem:[%s3621_s1 + $0x4] sm:$0xf]  ;;  %v2792_v9 = vld [vmem:[%s3621_s1 + $0xc] sm:$0xf]  ;;  %v2789_v10 = vld [vmem:[%s3621_s1 + $0x8] sm:$0xf] }
  0x23   : > { %332 = vrot.lane.b32.xlu0 %v327_v2, %s3205_s13  ;;  %568 = vrot.lane.b32.xlu1 %v327_v2, %s3206_s14  ;;  %v2795_v13 = vld [vmem:[%s3621_s1 + $0x10] sm:$0xf]  ;;  %v2798_v14 = vld [vmem:[%s3621_s1 + $0x14] sm:$0xf]  ;;  %vm2493_vm4 = vcmask 814080   ;;  %vm2508_vm5 = vcmask 3072  }
  0x24   : > { %2939 = vmatpush3.msk.msra.mxu1 %vm338_vm1, %v327_v2  ;;  %v2801_v17 = vld [vmem:[%s3621_s1 + $0x18] sm:$0xf]  ;;  %v2804_v18 = vld [vmem:[%s3621_s1 + $0x1c] sm:$0xf]  ;;  %v2807_v21 = vld [vmem:[%s3621_s1 + $0x20] sm:$0xf] }
  0x25   : > { %2941 = vmatmul.mubr.msk.f32.vlgmr.msra.gmra.mxu1 %vm334_vm3, %v328_v3  ;;  %2948 = vmatprep.subr.mxu1 %v3203_v1  ;;  %v2812_v22 = vld [vmem:[%s3621_s1 + $0x24] sm:$0xf]  ;;  %v2815_v25 = vld [vmem:[%s3621_s1 + $0x28] sm:$0xf]  ;;  %v2818_v26 = vld [vmem:[%s3621_s1 + $0x2c] sm:$0xf] }
  0x26   : > { %2950 = vmatprep.mubr.msk.f32.mxu1 %vm3204_vm2, %v3203_v1  ;;  %v2821_v29 = vld [vmem:[%s3621_s1 + $0x30] sm:$0xf]  ;;  %v2824_v30 = vld [vmem:[%s3621_s1 + $0x34] sm:$0xf]  ;;  %v2827_v33 = vld [vmem:[%s3621_s1 + $0x38] sm:$0xf] }
  0x27   : > { %488 = vrot.lane.b32.xlu0 %v327_v2, %s3207_s15  ;;  %648 = vrot.lane.b32.xlu1 %v327_v2, %s3208_s16  ;;  %v2830_v34 = vld [vmem:[%s3621_s1 + $0x3c] sm:$0xf]  ;;  %v2833_v37 = vld [vmem:[%s3621_s1 + $0x40] sm:$0xf] }
  0x28   : > { %v2836_v38 = vld [vmem:[%s3621_s1 + $0x44] sm:$0xf]  ;;  %v2841_v41 = vld [vmem:[%s3621_s1 + $0x48] sm:$0xf]  ;;  %v2844_v42 = vld [vmem:[%s3621_s1 + $0x4c] sm:$0xf] }
  0x29   : > { %v2847_v45 = vld [vmem:[%s3621_s1 + $0x50] sm:$0xf]  ;;  %v2850_v46 = vld [vmem:[%s3621_s1 + $0x54] sm:$0xf]  ;;  %v2853_v49 = vld [vmem:[%s3621_s1 + $0x58] sm:$0xf] }
  0x2a   : > { %v2856_v50 = vld [vmem:[%s3621_s1 + $0x5c] sm:$0xf]  ;;  %v2859_v52 = vld [vmem:[%s3621_s1 + $0x60] sm:$0xf]  ;;  %v2862_v53 = vld [vmem:[%s3621_s1 + $0x64] sm:$0xf] }
  0x2b   : > { %728 = vrot.lane.b32.xlu0 %v327_v2, %s3209_s17  ;;  %808 = vrot.lane.b32.xlu1 %v327_v2, %s3210_s18  ;;  %v2865_v55 = vld [vmem:[%s3621_s1 + $0x68] sm:$0xf] }
  0x2f   : > { %888 = vrot.lane.b32.xlu0 %v327_v2, %s3211_s19  ;;  %968 = vrot.lane.b32.xlu1 %v327_v2, %s3212_s20 }
  0x33   : > { %1131 = vrot.lane.b32.xlu0 %v3338_v4, %s3205_s13  ;;  %1211 = vrot.lane.b32.xlu1 %v3338_v4, %s3207_s15 }
  0x37   : > { %1291 = vrot.lane.b32.xlu0 %v3338_v4, %s3206_s14  ;;  %1371 = vrot.lane.b32.xlu1 %v3338_v4, %s3208_s16 }
  0x3b   : > { %1451 = vrot.lane.b32.xlu0 %v3338_v4, %s3209_s17  ;;  %1531 = vrot.lane.b32.xlu1 %v3338_v4, %s3210_s18 }
  0x3f   : > { %1611 = vrot.lane.b32.xlu0 %v3338_v4, %s3211_s19  ;;  %1691 = vrot.lane.b32.xlu1 %v3338_v4, %s3212_s20 }
  0x43   : > { %1854 = vrot.lane.b32.xlu0 %v3351_v5, %s3205_s13  ;;  %1934 = vrot.lane.b32.xlu1 %v3351_v5, %s3207_s15  ;;  %s2492_s15 = scalar_lea.vmem [#allocation6], %s2783_s23 }
  0x47   : > { %2014 = vrot.lane.b32.xlu0 %v3351_v5, %s3206_s14  ;;  %2094 = vrot.lane.b32.xlu1 %v3351_v5, %s3208_s16 }
  0x4b   : > { %2174 = vrot.lane.b32.xlu0 %v3351_v5, %s3209_s17  ;;  %2254 = vrot.lane.b32.xlu1 %v3351_v5, %s3210_s18 }
  0x4f   : > { %2334 = vrot.lane.b32.xlu0 %v3351_v5, %s3211_s19  ;;  %2414 = vrot.lane.b32.xlu1 %v3351_v5, %s3212_s20 }
  0x95   : > { %v333_v7 = vpop.permute.xlu0 %332  ;;  %v569_v8 = vpop.permute.xlu1 %568 }
  0x96   : > { %2934 = vmatpush3.msk.msra.mxu0 %vm338_vm1, %v333_v7  ;;  %2949 = vmatpush3.msk.msra.mxu1 %vm338_vm1, %v569_v8 }
  0x97   : > { %2936 = vmatmul.mubr.msk.f32.vlgmr.msra.gmra.mxu0 %vm334_vm3, %v2784_v6  ;;  %2943 = vmatprep.subr.mxu0 %v3203_v1 }
  0x98   : > { %2945 = vmatprep.mubr.msk.f32.mxu0 %vm3204_vm2, %v3203_v1  ;;  %2951 = vmatmul.mubr.msk.f32.vlgmr.msra.gmra.mxu1 %vm334_vm3, %v2792_v9 }
  0x99   : > { %v489_v11 = vpop.permute.xlu0 %488  ;;  %v649_v12 = vpop.permute.xlu1 %648  ;;  %2958 = vmatprep.subr.mxu1 %v3203_v1  ;;  %2960 = vmatprep.mubr.msk.f32.mxu1 %vm3204_vm2, %v3203_v1 }
  0x9a   : > { %2944 = vmatpush3.msk.msra.mxu0 %vm338_vm1, %v489_v11 }
  0x9b   : > { %2946 = vmatmul.mubr.msk.f32.vlgmr.msra.gmra.mxu0 %vm334_vm3, %v2789_v10  ;;  %2953 = vmatprep.subr.mxu0 %v3203_v1 }
  0x9c   : > { %2954 = vmatpush3.msk.msra.mxu0 %vm338_vm1, %v649_v12  ;;  %2955 = vmatprep.mubr.msk.f32.mxu0 %vm3204_vm2, %v3203_v1 }
  0x9d   : > { %v729_v15 = vpop.permute.xlu0 %728  ;;  %v809_v16 = vpop.permute.xlu1 %808  ;;  %2963 = vmatprep.subr.mxu0 %v3203_v1 }
  0x9e   : > { %2959 = vmatpush3.msk.msra.mxu1 %vm338_vm1, %v729_v15 }
  0x9f   : > { %2956 = vmatmul.mubr.msk.f32.vlgmr.msra.gmra.mxu0 %vm334_vm3, %v2795_v13  ;;  %2961 = vmatmul.mubr.msk.f32.vlgmr.msra.gmra.mxu1 %vm334_vm3, %v2798_v14 }
  0xa0   : > { %2964 = vmatpush3.msk.msra.mxu0 %vm338_vm1, %v809_v16  ;;  %2965 = vmatprep.mubr.msk.f32.mxu0 %vm3204_vm2, %v3203_v1 }
  0xa1   : > { %v889_v19 = vpop.permute.xlu0 %888  ;;  %2968 = vmatprep.subr.mxu1 %v3203_v1  ;;  %2970 = vmatprep.mubr.msk.f32.mxu1 %vm3204_vm2, %v3203_v1  ;;  %v969_v20 = vpop.permute.xlu1 %968 }
  0xa2   : > { %2969 = vmatpush3.msk.msra.mxu1 %vm338_vm1, %v889_v19  ;;  %2973 = vmatprep.subr.mxu0 %v3203_v1 }
  0xa3   : > { %2966 = vmatmul.mubr.msk.f32.vlgmr.msra.gmra.mxu0 %vm334_vm3, %v2801_v17  ;;  %2971 = vmatmul.mubr.msk.f32.vlgmr.msra.gmra.mxu1 %vm334_vm3, %v2804_v18 }
  0xa4   : > { %2974 = vmatpush3.msk.msra.mxu0 %vm338_vm1, %v969_v20  ;;  %2975 = vmatprep.mubr.msk.f32.mxu0 %vm3204_vm2, %v3203_v1 }
  0xa5   : > { %2978 = vmatprep.subr.mxu1 %v3203_v1  ;;  %2980 = vmatprep.mubr.msk.f32.mxu1 %vm3204_vm2, %v3203_v1  ;;  %v1132_v23 = vpop.permute.xlu0 %1131  ;;  %v1212_v24 = vpop.permute.xlu1 %1211 }
  0xa6   : > { %2979 = vmatpush3.msk.msra.mxu1 %vm338_vm1, %v3338_v4  ;;  %2983 = vmatprep.subr.mxu0 %v3203_v1 }
  0xa7   : > { %2976 = vmatmul.mubr.msk.f32.vlgmr.msra.gmra.mxu0 %vm334_vm3, %v2807_v21  ;;  %2981 = vmatmul.mubr.msk.f32.vlgmr.msra.gmra.mxu1 %vm334_vm3, %v2812_v22 }
  0xa8   : > { %2984 = vmatpush3.msk.msra.mxu0 %vm338_vm1, %v1132_v23  ;;  %2985 = vmatprep.mubr.msk.f32.mxu0 %vm3204_vm2, %v3203_v1 }
  0xa9   : > { %2988 = vmatprep.subr.mxu1 %v3203_v1  ;;  %2990 = vmatprep.mubr.msk.f32.mxu1 %vm3204_vm2, %v3203_v1  ;;  %v1292_v27 = vpop.permute.xlu0 %1291  ;;  %v1372_v28 = vpop.permute.xlu1 %1371 }
  0xaa   : > { %2989 = vmatpush3.msk.msra.mxu1 %vm338_vm1, %v1212_v24  ;;  %2993 = vmatprep.subr.mxu0 %v3203_v1 }
  0xab   : > { %2986 = vmatmul.mubr.msk.f32.vlgmr.msra.gmra.mxu0 %vm334_vm3, %v2815_v25  ;;  %2991 = vmatmul.mubr.msk.f32.vlgmr.msra.gmra.mxu1 %vm334_vm3, %v2818_v26 }
  0xac   : > { %2994 = vmatpush3.msk.msra.mxu0 %vm338_vm1, %v1292_v27  ;;  %2995 = vmatprep.mubr.msk.f32.mxu0 %vm3204_vm2, %v3203_v1 }
  0xad   : > { %2998 = vmatprep.subr.mxu1 %v3203_v1  ;;  %3000 = vmatprep.mubr.msk.f32.mxu1 %vm3204_vm2, %v3203_v1  ;;  %v1452_v31 = vpop.permute.xlu0 %1451  ;;  %v1532_v32 = vpop.permute.xlu1 %1531 }
  0xae   : > { %2999 = vmatpush3.msk.msra.mxu1 %vm338_vm1, %v1372_v28  ;;  %3003 = vmatprep.subr.mxu0 %v3203_v1 }
  0xaf   : > { %2996 = vmatmul.mubr.msk.f32.vlgmr.msra.gmra.mxu0 %vm334_vm3, %v2821_v29  ;;  %3001 = vmatmul.mubr.msk.f32.vlgmr.msra.gmra.mxu1 %vm334_vm3, %v2824_v30 }
  0xb0   : > { %3004 = vmatpush3.msk.msra.mxu0 %vm338_vm1, %v1452_v31  ;;  %3005 = vmatprep.mubr.msk.f32.mxu0 %vm3204_vm2, %v3203_v1 }
  0xb1   : > { %3008 = vmatprep.subr.mxu1 %v3203_v1  ;;  %3010 = vmatprep.mubr.msk.f32.mxu1 %vm3204_vm2, %v3203_v1  ;;  %v1612_v35 = vpop.permute.xlu0 %1611  ;;  %v1692_v36 = vpop.permute.xlu1 %1691 }
  0xb2   : > { %3009 = vmatpush3.msk.msra.mxu1 %vm338_vm1, %v1532_v32  ;;  %3013 = vmatprep.subr.mxu0 %v3203_v1 }
  0xb3   : > { %3006 = vmatmul.mubr.msk.f32.vlgmr.msra.gmra.mxu0 %vm334_vm3, %v2827_v33  ;;  %3011 = vmatmul.mubr.msk.f32.vlgmr.msra.gmra.mxu1 %vm334_vm3, %v2830_v34 }
  0xb4   : > { %3014 = vmatpush3.msk.msra.mxu0 %vm338_vm1, %v1612_v35  ;;  %3015 = vmatprep.mubr.msk.f32.mxu0 %vm3204_vm2, %v3203_v1 }
  0xb5   : > { %3018 = vmatprep.subr.mxu1 %v3203_v1  ;;  %3020 = vmatprep.mubr.msk.f32.mxu1 %vm3204_vm2, %v3203_v1  ;;  %v1855_v39 = vpop.permute.xlu0 %1854  ;;  %v1935_v40 = vpop.permute.xlu1 %1934 }
  0xb6   : > { %3019 = vmatpush3.msk.msra.mxu1 %vm338_vm1, %v1692_v36  ;;  %3023 = vmatprep.subr.mxu0 %v3203_v1 }
  0xb7   : > { %3016 = vmatmul.mubr.msk.f32.vlgmr.msra.gmra.mxu0 %vm334_vm3, %v2833_v37  ;;  %3021 = vmatmul.mubr.msk.f32.vlgmr.msra.gmra.mxu1 %vm334_vm3, %v2836_v38 }
  0xb8   : > { %3024 = vmatpush3.msk.msra.mxu0 %vm338_vm1, %v3351_v5  ;;  %3025 = vmatprep.mubr.msk.f32.mxu0 %vm3204_vm2, %v3203_v1 }
  0xb9   : > { %3028 = vmatprep.subr.mxu1 %v3203_v1  ;;  %3030 = vmatprep.mubr.msk.f32.mxu1 %vm3204_vm2, %v3203_v1  ;;  %v2015_v43 = vpop.permute.xlu0 %2014  ;;  %v2095_v44 = vpop.permute.xlu1 %2094 }
  0xba   : > { %3029 = vmatpush3.msk.msra.mxu1 %vm338_vm1, %v1855_v39  ;;  %3033 = vmatprep.subr.mxu0 %v3203_v1 }
  0xbb   : > { %3026 = vmatmul.mubr.msk.f32.vlgmr.msra.gmra.mxu0 %vm334_vm3, %v2841_v41  ;;  %3031 = vmatmul.mubr.msk.f32.vlgmr.msra.gmra.mxu1 %vm334_vm3, %v2844_v42 }
  0xbc   : > { %3034 = vmatpush3.msk.msra.mxu0 %vm338_vm1, %v1935_v40  ;;  %3035 = vmatprep.mubr.msk.f32.mxu0 %vm3204_vm2, %v3203_v1 }
  0xbd   : > { %3038 = vmatprep.subr.mxu1 %v3203_v1  ;;  %3040 = vmatprep.mubr.msk.f32.mxu1 %vm3204_vm2, %v3203_v1  ;;  %v2175_v47 = vpop.permute.xlu0 %2174  ;;  %v2255_v48 = vpop.permute.xlu1 %2254 }
  0xbe   : > { %3039 = vmatpush3.msk.msra.mxu1 %vm338_vm1, %v2015_v43  ;;  %3043 = vmatprep.subr.mxu0 %v3203_v1 }
  0xbf   : > { %3036 = vmatmul.mubr.msk.f32.vlgmr.msra.gmra.mxu0 %vm334_vm3, %v2847_v45  ;;  %3041 = vmatmul.mubr.msk.f32.vlgmr.msra.gmra.mxu1 %vm334_vm3, %v2850_v46 }
  0xc0   : > { %3044 = vmatpush3.msk.msra.mxu0 %vm338_vm1, %v2095_v44  ;;  %3045 = vmatprep.mubr.msk.f32.mxu0 %vm3204_vm2, %v3203_v1 }
  0xc1   : > { %3048 = vmatprep.subr.mxu1 %v3203_v1  ;;  %3050 = vmatprep.mubr.msk.f32.mxu1 %vm3204_vm2, %v3203_v1  ;;  %v2335_v51 = vpop.permute.xlu0 %2334  ;;  %v2415_v54 = vpop.permute.xlu1 %2414 }
  0xc2   : > { %3049 = vmatpush3.msk.msra.mxu1 %vm338_vm1, %v2175_v47  ;;  %3053 = vmatprep.subr.mxu0 %v3203_v1 }
  0xc3   : > { %3046 = vmatmul.mubr.msk.f32.vlgmr.msra.gmra.mxu0 %vm334_vm3, %v2853_v49  ;;  %3051 = vmatmul.mubr.msk.f32.vlgmr.msra.gmra.mxu1 %vm334_vm3, %v2856_v50 }
  0xc4   : > { %3054 = vmatpush3.msk.msra.mxu0 %vm338_vm1, %v2255_v48  ;;  %3055 = vmatprep.mubr.msk.f32.mxu0 %vm3204_vm2, %v3203_v1 }
  0xc5   : > { %3058 = vmatprep.subr.mxu1 %v3203_v1  ;;  %3060 = vmatprep.mubr.msk.f32.mxu1 %vm3204_vm2, %v3203_v1 }
  0xc6   : > { %3059 = vmatpush3.msk.msra.mxu1 %vm338_vm1, %v2335_v51  ;;  %3063 = vmatprep.subr.mxu0 %v3203_v1 }
  0xc7   : > { %3056 = vmatmul.mubr.msk.f32.vlgmr.msra.gmra.mxu0 %vm334_vm3, %v2859_v52  ;;  %3061 = vmatmul.mubr.msk.f32.vlgmr.msra.gmra.mxu1 %vm334_vm3, %v2862_v53 }
  0xc8   : > { %3064 = vmatpush3.msk.msra.mxu0 %vm338_vm1, %v2415_v54  ;;  %3065 = vmatprep.mubr.msk.f32.mxu0 %vm3204_vm2, %v3203_v1 }
  0xcb   : > { %3066 = vmatmul.mubr.msk.f32.vlgmr.msra.gmra.mxu0 %vm334_vm3, %v2865_v55 }
  0xe5   : > { %v482_v56 = vpop.f32.mrf.mxu1 }
  0xe7   : > { %v2942_v57 = vpop.f32.mrf.mxu1 }
 0x157   : > { %v407_v58 = vpop.f32.mrf.mxu0 }
 0x158   : > { %v641_v59 = vpop.f32.mrf.mxu1  ;;  %v483_v61 = vadd.f32 %v482_v56, %v407_v58 }
 0x159   : > { %v2937_v60 = vpop.f32.mrf.mxu0 }
 0x15a   : > { %v2952_v62 = vpop.f32.mrf.mxu1 }
 0x15b   : > { %v561_v63 = vpop.f32.mrf.mxu0 }
 0x15c   : > { %v565_v0 = vadd.f32 %v561_v63, %v483_v61 }
 0x15d   : > { %v2947_v2 = vpop.f32.mrf.mxu0 }
 0x15e   : > { %v645_v3 = vadd.f32 %v641_v59, %v565_v0 }
 0x15f   : > { %v721_v4 = vpop.f32.mrf.mxu0  ;;  %v801_v5 = vpop.f32.mrf.mxu1 }
 0x160   : > { %v725_v1 = vadd.f32 %v721_v4, %v645_v3 }
 0x161   : > { %v2957_v6 = vpop.f32.mrf.mxu0  ;;  %v2962_v7 = vpop.f32.mrf.mxu1 }
 0x162   : > { %v805_v8 = vadd.f32 %v801_v5, %v725_v1  ;;  %v2868_v6 = vld [vmem:[%s3626_s6] ss:$0 sm:$0xff] }
 0x163   : > { %v881_v9 = vpop.f32.mrf.mxu0  ;;  %v961_v10 = vpop.f32.mrf.mxu1 }
 0x164   : > { %v885_v11 = vadd.f32 %v881_v9, %v805_v8 }
 0x165   : > { %v2967_v12 = vpop.f32.mrf.mxu0  ;;  %v2972_v13 = vpop.f32.mrf.mxu1 }
 0x166   : > { %v965_v14 = vadd.f32 %v961_v10, %v885_v11  ;;  %v2503_v13 = vld [vmem:[#allocation2] sm:$0xf] }
 0x167   : > { %v1041_v15 = vpop.f32.mrf.mxu0  ;;  %v1124_v16 = vpop.f32.mrf.mxu1 }
 0x168   : > { %v1045_v17 = vadd.f32 %v1041_v15, %v965_v14  ;;  %v2510_v15 = vld [vmem:[#allocation3] sm:$0xf] }
 0x169   : > { %v2977_v18 = vpop.f32.mrf.mxu0  ;;  %v2982_v19 = vpop.f32.mrf.mxu1 }
 0x16a   : > { %v1128_v20 = vadd.f32 %v1124_v16, %v1045_v17 }
 0x16b   : > { %v1204_v21 = vpop.f32.mrf.mxu0  ;;  %v1284_v22 = vpop.f32.mrf.mxu1 }
 0x16c   : > { %v1208_v23 = vadd.f32 %v1204_v21, %v1128_v20 }
 0x16d   : > { %v2987_v24 = vpop.f32.mrf.mxu0  ;;  %v2992_v25 = vpop.f32.mrf.mxu1 }
 0x16e   : > { %v1288_v26 = vadd.f32 %v1284_v22, %v1208_v23 }
 0x16f   : > { %v1364_v27 = vpop.f32.mrf.mxu0  ;;  %v1444_v28 = vpop.f32.mrf.mxu1 }
 0x170   : > { %v1368_v29 = vadd.f32 %v1364_v27, %v1288_v26 }
 0x171   : > { %v2997_v30 = vpop.f32.mrf.mxu0  ;;  %v3002_v31 = vpop.f32.mrf.mxu1 }
 0x172   : > { %v1448_v32 = vadd.f32 %v1444_v28, %v1368_v29 }
 0x173   : > { %v1524_v33 = vpop.f32.mrf.mxu0  ;;  %v1604_v34 = vpop.f32.mrf.mxu1 }
 0x174   : > { %v1528_v35 = vadd.f32 %v1524_v33, %v1448_v32 }
 0x175   : > { %v3007_v36 = vpop.f32.mrf.mxu0  ;;  %v3012_v37 = vpop.f32.mrf.mxu1 }
 0x176   : > { %v1608_v38 = vadd.f32 %v1604_v34, %v1528_v35 }
 0x177   : > { %v1684_v39 = vpop.f32.mrf.mxu0  ;;  %v1764_v40 = vpop.f32.mrf.mxu1 }
 0x178   : > { %v1688_v41 = vadd.f32 %v1684_v39, %v1608_v38 }
 0x179   : > { %v3017_v42 = vpop.f32.mrf.mxu0  ;;  %v3022_v43 = vpop.f32.mrf.mxu1 }
 0x17a   : > { %v1768_v44 = vadd.f32 %v1764_v40, %v1688_v41 }
 0x17b   : > { %v1847_v45 = vpop.f32.mrf.mxu0  ;;  %v1927_v46 = vpop.f32.mrf.mxu1 }
 0x17c   : > { %v1851_v47 = vadd.f32 %v1847_v45, %v1768_v44 }
 0x17d   : > { %v3027_v48 = vpop.f32.mrf.mxu0  ;;  %v3032_v49 = vpop.f32.mrf.mxu1 }
 0x17e   : > { %v1931_v50 = vadd.f32 %v1927_v46, %v1851_v47 }
 0x17f   : > { %v2007_v51 = vpop.f32.mrf.mxu0  ;;  %v2087_v52 = vpop.f32.mrf.mxu1 }
 0x180   : > { %v2011_v53 = vadd.f32 %v2007_v51, %v1931_v50 }
 0x181   : > { %v3037_v54 = vpop.f32.mrf.mxu0  ;;  %v3042_v55 = vpop.f32.mrf.mxu1 }
 0x182   : > { %v2091_v56 = vadd.f32 %v2087_v52, %v2011_v53 }
 0x183   : > { %v2167_v57 = vpop.f32.mrf.mxu0  ;;  %v2247_v58 = vpop.f32.mrf.mxu1 }
 0x184   : > { %v2171_v59 = vadd.f32 %v2167_v57, %v2091_v56 }
 0x185   : > { %v3047_v60 = vpop.f32.mrf.mxu0  ;;  %v3052_v61 = vpop.f32.mrf.mxu1 }
 0x186   : > { %v2251_v62 = vadd.f32 %v2247_v58, %v2171_v59 }
 0x187   : > { %v2327_v63 = vpop.f32.mrf.mxu0  ;;  %v2407_v0 = vpop.f32.mrf.mxu1 }
 0x188   : > { %v2331_v2 = vadd.f32 %v2327_v63, %v2251_v62 }
 0x189   : > { %v3057_v3 = vpop.f32.mrf.mxu0  ;;  %v3062_v4 = vpop.f32.mrf.mxu1 }
 0x18a   : > { %v2411_v5 = vadd.f32 %v2407_v0, %v2331_v2 }
 0x18b   : > { %v2487_v1 = vpop.f32.mrf.mxu0 }
 0x18c   : > { %v2491_v7 = vadd.f32 %v2487_v1, %v2411_v5 }
 0x18d   : > { %v3067_v8 = vpop.f32.mrf.mxu0 }
 0x18e   : > { %v2502_v9 = vmul.f32 %v2868_v6, %v2491_v7  ;;  %2494 = vst.msk [vmem:[%s2492_s15] sm:$0xf] %vm2493_vm4, %v2491_v7 }
 0x190   : > { %v2504_v10 = vsel %vm2493_vm4, %v2502_v9, 0.0  ;;  %v2511_v11 = vmul.f32 %v2502_v9, %v2491_v7 }
 0x191   : > { %2505 = vadd.xlane.f32.xlu0 %v2504_v10 }
 0x192   : > { %v2512_v12 = vsel %vm2493_vm4, %v2511_v11, 0.0 }
 0x193   : > { %2513 = vadd.xlane.f32.xlu1 %v2512_v12 }
 0x21a   : > { %v2506_v14 = vpop.xlane.xlu0 %2505 }
 0x21b   : > { %v2507_v16 = vadd.f32 %v2506_v14, %v2503_v13 }
 0x21c   : > { %v2514_v17 = vpop.xlane.xlu1 %2513 }
 0x21d   : > { %2509 = vst.msk [vmem:[#allocation2] sm:$0xf] %vm2508_vm5, %v2507_v16  ;;  %v2515_v18 = vadd.f32 %v2514_v17, %v2510_v15 }
 0x21f   : > { %2516 = vst.msk [vmem:[#allocation3] sm:$0xf] %vm2508_vm5, %v2515_v18 }
 0x220 PF: > { %p2517_p12 = scmp.eq.s32.totalorder %s3176_s24, 7 }
 0x222   : > { %p2518_p13 = pnand %p2517_p12, %p313_p7 }
 0x224   : > { %2521 = sbr.rel (%p2518_p13) target bundleno = 585 (0x249), region = 60 }
 0x229   : > { %v2522_v19 = vld [vmem:[#allocation2] sm:$0xf]  ;;  %v2524_v20 = vld [vmem:[#allocation3] sm:$0xf]  ;;  %vm2533_vm6 = vcmask 3072  }
 0x22a   : > { %v2523_v21 = vmul.f32 0.001953125, %v2522_v19  ;;  %v2525_v22 = vmul.f32 0.001953125, %v2524_v20  ;;  %v2531_v27 = vld [vmem:[%s3622_s2] sm:$0xf] }
 0x22b   : > { %v2535_v30 = vld [vmem:[%s3623_s3] sm:$0xf] }
 0x22c   : > { %v2526_v23 = vmul.f32 %v2523_v21, %v2523_v21 }
 0x22e   : > { %v2527_v24 = vsub.f32 %v2525_v22, %v2526_v23 }
 0x230   : > { %v2528_v25 = vmax.f32 %v2527_v24, 0.0 }
 0x232   : > { %v2529_v26 = vadd.f32 1e-05, %v2528_v25 }
 0x234   : > { %3142 = vrsqrt.f32 %v2529_v26 }
 0x241   : > { %v3143_v28 = vpop.eup %3142 }
 0x242   : > { %v2532_v29 = vmul.f32 %v3143_v28, %v2531_v27 }
 0x244   : > { %2534 = vst.msk [vmem:[#allocation4] sm:$0xf] %vm2533_vm6, %v2532_v29  ;;  %v2536_v31 = vmul.f32 %v2532_v29, %v2523_v21 }
 0x246   : > { %v2537_v32 = vsub.f32 %v2535_v30, %v2536_v31 }
 0x248   : > { %2538 = vst.msk [vmem:[#allocation5] sm:$0xf] %vm2533_vm6, %v2537_v32 }
 0x249 PF: > { %p2869_p0 = scmp.ne.s32.totalorder %s3180_s25, 1 }
 0x24a   : > { %s2870_s12 = sshll.u32 (!%p2869_p0), %s3176_s24, 2 }
 0x24b   : > { %2542 = sbr.rel (%p2869_p0) target bundleno = 928 (0x3a0), region = 64  ;;  %s2544_s13 = scalar_lea.vmem (!%p2869_p0), [#allocation6], %s2870_s12 }
 0x250   : > { %v2546_v33 = vld [vmem:[#allocation4] sm:$0xf]  ;;  %v3213_v34 = vmov 0   ;;  %v2553_v35 = vld [vmem:[#allocation5] sm:$0xf]  ;;  %v2562_v36 = vld [vmem:[%s3624_s4] sm:$0xff] }
 0x251   : > { %3144 = vset.pattern.permute.xlu0 %v3213_v34  ;;  %3145 = vset.pattern.permute.xlu1 %v3213_v34  ;;  %vm2576_vm7 = vcmask 31744   ;;  %v2564_v37 = vld [vmem:[%s3625_s5] sm:$0xff]  ;;  %v2565_v38 = vld [vmem:[%s3625_s5 + $0x8] sm:$0xff]  ;;  %vm2583_vm8 = vcmask 1043456   ;;  %vm2662_vm9 = vcmask 818176  }
 0x252   : > { %2549 = vperm.xlu0 %3144, %v2546_v33   ;;  %3070 = vmatprep.mubr.msk.f32.mxu0 %vm2576_vm7, %v2562_v36  ;;  %v2545_v40 = vld [vmem:[%s2544_s13] sm:$0xf]  ;;  %v2563_v46 = vld [vmem:[%s3624_s4 + $0x8] sm:$0xff] }
 0x253   : > { %2568 = vperm.xlu1 %3145, %v2564_v37  }
 0x256   : > { %2556 = vperm.xlu0 %3144, %v2553_v35  }
 0x257   : > { %2573 = vperm.xlu1 %3145, %v2565_v38  }
 0x2cd   : > { %v2550_v39 = vpop.permute.xlu0 %2549 }
 0x2ce   : > { %v2552_v41 = vmul.f32 %v2550_v39, %v2545_v40  ;;  %v2569_v47 = vpop.permute.xlu1 %2568 }
 0x2d1   : > { %v2557_v42 = vpop.permute.xlu0 %2556 }
 0x2d2   : > { %v2559_v43 = vadd.f32 %v2557_v42, %v2552_v41  ;;  %v2574_v48 = vpop.permute.xlu1 %2573 }
 0x2d4   : > { %v2560_v44 = vmul.f32 0.2, %v2559_v43 }
 0x2d6   : > { %v2561_v45 = vmax.f32 %v2559_v43, %v2560_v44 }
 0x2d8   : > { %3068 = vmatprep.subr.msk.mxu0 %vm2583_vm8, %v2561_v45 }
 0x2d9   : > { %3069 = vmatpush3.msk.msra.mxu0 %vm2583_vm8, %v2561_v45 }
 0x2da   : > { %3071 = vmatmul.mubr.msk.f32.vlgmr.msra.gmra.mxu0 %vm2576_vm7, %v2563_v46 }
 0x39a   : > { %v3072_v49 = vpop.f32.mrf.mxu0 }
 0x39b   : > { %v2659_v50 = vadd.f32 %v3072_v49, %v2574_v48 }
 0x39c   : > { %v2653_v51 = vpop.f32.mrf.mxu0 }
 0x39d   : > { %2664 = vst.msk [vmem:[%s3312_s22 + $0x8] sm:$0xff] %vm2662_vm9, %v2659_v50  ;;  %v2654_v52 = vadd.f32 %v2653_v51, %v2569_v47 }
 0x39f   : > { %2663 = vst.msk [vmem:[%s3312_s22] sm:$0xff] %vm2662_vm9, %v2654_v52 }
 0x3a0 PF: > { %s17_s30 = sadd.s32 1, %s3200_s30   ;;  %s3628_s24 = smov %s3188_s27 }
 0x3a1   : > { %p14_p1 = scmp.ge.s32.totalorder %s17_s30, 34   ;;  %s3629_s25 = smov %s3192_s28 }
 0x3a2   : > { %s3630_s26 = smov %s3196_s29  ;;  %s3631_s27 = smov %s3635_s8 }
 0x3a3   : > { %s3632_s28 = smov %s3639_s9  ;;  %s3633_s29 = smov %s3643_s10 }
 0x3a4   :  { %16 = sbr.rel (!%p14_p1) target bundleno = 4 (0x4), region = 125 }

</bundles_post_ra>
